<compile_context>
chip_gen: v7x
topology: tpu7x:2x2x1
jax: 0.10.0
libtpu: 0.0.40
codegen_flags: <defaults>
</compile_context>

<pallas_src>
import jax
import jax.numpy as jnp
from jax import lax
from jax.experimental import pallas as pl
from jax.experimental.pallas import tpu as pltpu

# ---- small synthetic config (tiny llama-like causal LM) ----
B, S, D = 2, 8, 32          # batch, sequence, hidden
H, HD = 2, 16               # heads, head_dim (H * HD == D)
I = 64                      # MLP intermediate size
V = 128                     # vocab size
L = 2                       # decoder layers
EPS = 1e-6
BS = B * S
NEG_INF = -1e30             # safe only because scores stay f32


def _rmsnorm(x, gamma):
    var = jnp.mean(x * x, axis=-1, keepdims=True)
    return x * lax.rsqrt(var + EPS) * gamma


# ----------------------------- Pallas kernel ---------------------------------
def _causal_lm_kernel(x_ref, cos_ref, rsin_ref, bias_ref,
                      ln1_ref, ln2_ref, wqkv_ref, wo_ref, wgu_ref, wd_ref,
                      lnf_ref, wlm_ref, logits_ref):
    """Entire forward (all layers + final norm + LM head) for the whole
    (B*S, D) activation slab, fully VMEM-resident."""
    x = x_ref[...]                         # (BS, D)  f32 residual stream
    cos = cos_ref[...][None]               # (1, BS, HD)
    rsin = rsin_ref[...][None]             # (1, BS, HD) sign-folded sin
    bias = bias_ref[...][None]             # (1, BS, BS) block-diag causal bias
    scale = 1.0 / (HD ** 0.5)

    for l in range(L):                     # static unroll, L = 2
        # ---- attention: RMSNorm -> head-batched fused QKV -> RoPE -> SDPA ----
        h = _rmsnorm(x, ln1_ref[l]).astype(jnp.bfloat16)             # (BS, D)
        h_b = jnp.broadcast_to(h[None], (H, BS, D))                  # (H, BS, D)
        qkv = jnp.einsum('hsd,hdf->hsf', h_b, wqkv_ref[l],
                         preferred_element_type=jnp.float32)         # (H, BS, 3HD)
        q = qkv[:, :, :HD]
        k = qkv[:, :, HD:2 * HD]
        v = qkv[:, :, 2 * HD:]
        # RoPE (llama non-interleaved concat(freqs,freqs) layout); rotate_half
        # on the XLU via roll, sign already folded into rsin; 1/sqrt(HD) in q.
        q = (q * cos + pltpu.roll(q, HD // 2, 2) * rsin) * scale
        k = k * cos + pltpu.roll(k, HD // 2, 2) * rsin
        s = jnp.einsum('hqd,hkd->hqk', q.astype(jnp.bfloat16),
                       k.astype(jnp.bfloat16),
                       preferred_element_type=jnp.float32) + bias    # (H, BS, BS)
        m = jnp.max(s, axis=-1, keepdims=True)
        p = jnp.exp(s - m)
        inv = pl.reciprocal(jnp.sum(p, axis=-1, keepdims=True), approx=True)
        o = jnp.einsum('hqk,hkd->hqd', p.astype(jnp.bfloat16),
                       v.astype(jnp.bfloat16),
                       preferred_element_type=jnp.float32) * inv     # (H, BS, HD)
        oh = jnp.einsum('hsd,hdf->hsf', o.astype(jnp.bfloat16), wo_ref[l],
                        preferred_element_type=jnp.float32)          # (H, BS, D)
        x = x + jnp.sum(oh, axis=0)                                  # head merge

        # ---- MLP: RMSNorm -> fused gate|up -> SwiGLU -> down-proj -> +res ----
        h2 = _rmsnorm(x, ln2_ref[l]).astype(jnp.bfloat16)
        gu = jnp.dot(h2, wgu_ref[l], preferred_element_type=jnp.float32)  # (BS, 2I)
        g = gu[:, :I]
        u = gu[:, I:]
        act = (g * jax.nn.sigmoid(g) * u).astype(jnp.bfloat16)
        x = x + jnp.dot(act, wd_ref[l], preferred_element_type=jnp.float32)

    # ---- final RMSNorm + LM head (lane-dense V=128 output) ----
    hf = _rmsnorm(x, lnf_ref[...]).astype(jnp.bfloat16)
    logits_ref[...] = jnp.dot(hf, wlm_ref[...],
                              preferred_element_type=jnp.float32)


# ------------------------------ JAX glue --------------------------------------
def causal_lm_forward(input_ids, params, cos, rsin, bias):
    """Mimics BaseModelForCausalLM.forward -> logits (B, S, V)."""
    x = params["embed"][input_ids.reshape(-1)]            # (BS, D) gather (glue)
    logits = pl.pallas_call(
        _causal_lm_kernel,
        out_shape=jax.ShapeDtypeStruct((BS, V), jnp.float32),
        grid=(1,),
        in_specs=[
            pl.BlockSpec((BS, D), lambda i: (0, 0)),                 # x
            pl.BlockSpec((BS, HD), lambda i: (0, 0)),                # rope cos
            pl.BlockSpec((BS, HD), lambda i: (0, 0)),                # rope rsin
            pl.BlockSpec((BS, BS), lambda i: (0, 0)),                # causal bias
            pl.BlockSpec((L, 1, D), lambda i: (0, 0, 0)),            # ln1 gammas
            pl.BlockSpec((L, 1, D), lambda i: (0, 0, 0)),            # ln2 gammas
            pl.BlockSpec((L, H, D, 3 * HD), lambda i: (0, 0, 0, 0)), # wqkv (head-major)
            pl.BlockSpec((L, H, HD, D), lambda i: (0, 0, 0, 0)),     # wo (head-major)
            pl.BlockSpec((L, D, 2 * I), lambda i: (0, 0, 0)),        # w_gate_up
            pl.BlockSpec((L, I, D), lambda i: (0, 0, 0)),            # w_down
            pl.BlockSpec((1, D), lambda i: (0, 0)),                  # ln_f gamma
            pl.BlockSpec((D, V), lambda i: (0, 0)),                  # lm_head
        ],
        out_specs=pl.BlockSpec((BS, V), lambda i: (0, 0)),
        compiler_params=pltpu.CompilerParams(
            dimension_semantics=("arbitrary",)),
    )(x, cos, rsin, bias,
      params["ln1"], params["ln2"], params["wqkv"], params["wo"],
      params["wgu"], params["wd"], params["ln_f"], params["lm_head"])
    return logits.reshape(B, S, V)


def _rope_tables():
    """cos and sign-folded sin for llama-style (non-interleaved) RoPE,
    tiled over the batch so rows match the (B*S, D) activation slab."""
    inv_freq = 1.0 / (10000.0 ** (jnp.arange(0, HD, 2, dtype=jnp.float32) / HD))
    t = jnp.arange(S, dtype=jnp.float32)
    freqs = jnp.outer(t, inv_freq)                        # (S, HD/2)
    emb = jnp.concatenate([freqs, freqs], axis=-1)        # (S, HD)
    cos, sin = jnp.cos(emb), jnp.sin(emb)
    rsin = jnp.concatenate([-sin[:, :HD // 2], sin[:, HD // 2:]], axis=-1)
    return jnp.tile(cos, (B, 1)), jnp.tile(rsin, (B, 1))  # (B*S, HD) each


def _attn_bias():
    """Block-diagonal causal additive bias over the flattened (B*S) rows:
    attend only within the same batch element and to non-future positions."""
    pos = jnp.arange(BS)
    bid = pos // S
    ok = (bid[:, None] == bid[None, :]) & (pos[None, :] <= pos[:, None])
    return jnp.where(ok, 0.0, NEG_INF).astype(jnp.float32)     # (BS, BS)


def init_params(key):
    scale = 0.02
    keys = jax.random.split(key, 6)

    def w(k, shape):
        return (jax.random.normal(k, shape, jnp.float32) * scale).astype(jnp.bfloat16)

    return {
        "embed": jax.random.normal(keys[0], (V, D), jnp.float32) * scale,
        "ln1": jnp.ones((L, 1, D), jnp.float32),
        "ln2": jnp.ones((L, 1, D), jnp.float32),
        "ln_f": jnp.ones((1, D), jnp.float32),
        "wqkv": w(keys[1], (L, H, D, 3 * HD)),   # per-head fused q|k|v projection
        "wo":   w(keys[2], (L, H, HD, D)),       # per-head output projection
        "wgu":  w(keys[3], (L, D, 2 * I)),       # fused gate|up projection
        "wd":   w(keys[4], (L, I, D)),
        "lm_head": w(keys[5], (D, V)),
    }


if __name__ == "__main__":
    key = jax.random.PRNGKey(0)
    pkey, dkey = jax.random.split(key)
    params = init_params(pkey)
    input_ids = jax.random.randint(dkey, (B, S), 0, V, dtype=jnp.int32)

    cos, rsin = _rope_tables()
    bias = _attn_bias()

    fwd = jax.jit(causal_lm_forward)
    logits = fwd(input_ids, params, cos, rsin, bias)
    jax.block_until_ready(logits)

    assert logits.shape == (B, S, V)
    assert bool(jnp.all(jnp.isfinite(logits)))
    print("KERNEL_OK")
</pallas_src>

<mosaic_0001>
module attributes {stable_mosaic.version = 11 : i64} {
  func.func @_causal_lm_kernel(%arg0: i32, %arg1: memref<16x32xf32, #tpu.memory_space<vmem>>, %arg2: memref<16x16xf32, #tpu.memory_space<vmem>>, %arg3: memref<16x16xf32, #tpu.memory_space<vmem>>, %arg4: memref<16x16xf32, #tpu.memory_space<vmem>>, %arg5: memref<2x1x32xf32, #tpu.memory_space<vmem>>, %arg6: memref<2x1x32xf32, #tpu.memory_space<vmem>>, %arg7: memref<2x2x32x48xbf16, #tpu.memory_space<vmem>>, %arg8: memref<2x2x16x32xbf16, #tpu.memory_space<vmem>>, %arg9: memref<2x32x128xbf16, #tpu.memory_space<vmem>>, %arg10: memref<2x64x32xbf16, #tpu.memory_space<vmem>>, %arg11: memref<1x32xf32, #tpu.memory_space<vmem>>, %arg12: memref<32x128xbf16, #tpu.memory_space<vmem>>, %arg13: memref<16x128xf32, #tpu.memory_space<vmem>>) attributes {dimension_semantics = [#tpu.dimension_semantics<arbitrary>], iteration_bounds = array<i64: 1>, scalar_prefetch = 0 : i64, scratch_operands = 0 : i64, tpu.core_type = #tpu.core_type<tc>, window_params = [{pipeline_mode = #tpu.pipeline_mode<synchronous>, transform_indices = @transform_0, window_bounds = array<i64: 16, 32>}, {pipeline_mode = #tpu.pipeline_mode<synchronous>, transform_indices = @transform_1, window_bounds = array<i64: 16, 16>}, {pipeline_mode = #tpu.pipeline_mode<synchronous>, transform_indices = @transform_2, window_bounds = array<i64: 16, 16>}, {pipeline_mode = #tpu.pipeline_mode<synchronous>, transform_indices = @transform_3, window_bounds = array<i64: 16, 16>}, {pipeline_mode = #tpu.pipeline_mode<synchronous>, transform_indices = @transform_4, window_bounds = array<i64: 2, 1, 32>}, {pipeline_mode = #tpu.pipeline_mode<synchronous>, transform_indices = @transform_5, window_bounds = array<i64: 2, 1, 32>}, {pipeline_mode = #tpu.pipeline_mode<synchronous>, transform_indices = @transform_6, window_bounds = array<i64: 2, 2, 32, 48>}, {pipeline_mode = #tpu.pipeline_mode<synchronous>, transform_indices = @transform_7, window_bounds = array<i64: 2, 2, 16, 32>}, {pipeline_mode = #tpu.pipeline_mode<synchronous>, transform_indices = @transform_8, window_bounds = array<i64: 2, 32, 128>}, {pipeline_mode = #tpu.pipeline_mode<synchronous>, transform_indices = @transform_9, window_bounds = array<i64: 2, 64, 32>}, {pipeline_mode = #tpu.pipeline_mode<synchronous>, transform_indices = @transform_10, window_bounds = array<i64: 1, 32>}, {pipeline_mode = #tpu.pipeline_mode<synchronous>, transform_indices = @transform_11, window_bounds = array<i64: 32, 128>}, {pipeline_mode = #tpu.pipeline_mode<synchronous>, transform_indices = @transform_12, window_bounds = array<i64: 16, 128>}]} {
    %c0 = arith.constant 0 : index
    %c0_0 = arith.constant 0 : index
    %0 = vector.load %arg1[%c0, %c0_0] : memref<16x32xf32, #tpu.memory_space<vmem>>, vector<16x32xf32>
    %c0_1 = arith.constant 0 : index
    %c0_2 = arith.constant 0 : index
    %1 = vector.load %arg2[%c0_1, %c0_2] : memref<16x16xf32, #tpu.memory_space<vmem>>, vector<16x16xf32>
    %2 = vector.shape_cast %1 : vector<16x16xf32> to vector<1x16x16xf32>
    %c0_3 = arith.constant 0 : index
    %c0_4 = arith.constant 0 : index
    %3 = vector.load %arg3[%c0_3, %c0_4] : memref<16x16xf32, #tpu.memory_space<vmem>>, vector<16x16xf32>
    %4 = vector.shape_cast %3 : vector<16x16xf32> to vector<1x16x16xf32>
    %c0_5 = arith.constant 0 : index
    %c0_6 = arith.constant 0 : index
    %5 = vector.load %arg4[%c0_5, %c0_6] : memref<16x16xf32, #tpu.memory_space<vmem>>, vector<16x16xf32>
    %6 = vector.shape_cast %5 : vector<16x16xf32> to vector<1x16x16xf32>
    %c0_7 = arith.constant 0 : index
    %c0_8 = arith.constant 0 : index
    %c0_9 = arith.constant 0 : index
    %7 = vector.load %arg5[%c0_7, %c0_8, %c0_9] : memref<2x1x32xf32, #tpu.memory_space<vmem>>, vector<1x1x32xf32>
    %8 = vector.shape_cast %7 : vector<1x1x32xf32> to vector<1x32xf32>
    %9 = arith.mulf %0, %0 : vector<16x32xf32>
    %cst = arith.constant dense<0.000000e+00> : vector<16xf32>
    %10 = vector.multi_reduction <add>, %9, %cst [1] : vector<16x32xf32> to vector<16xf32>
    %11 = vector.shape_cast %10 : vector<16xf32> to vector<16x1xf32>
    %cst_10 = arith.constant 3.200000e+01 : f32
    %12 = vector.broadcast %cst_10 : f32 to vector<16x1xf32>
    %13 = arith.divf %11, %12 : vector<16x1xf32>
    %cst_11 = arith.constant 9.99999997E-7 : f32
    %14 = vector.broadcast %cst_11 : f32 to vector<16x1xf32>
    %15 = arith.addf %13, %14 : vector<16x1xf32>
    %16 = math.rsqrt %15 : vector<16x1xf32>
    %17 = vector.broadcast %16 : vector<16x1xf32> to vector<16x32xf32>
    %18 = arith.mulf %0, %17 : vector<16x32xf32>
    %19 = vector.broadcast %8 : vector<1x32xf32> to vector<16x32xf32>
    %20 = arith.mulf %18, %19 : vector<16x32xf32>
    %21 = arith.truncf %20 : vector<16x32xf32> to vector<16x32xbf16>
    %22 = vector.shape_cast %21 : vector<16x32xbf16> to vector<1x16x32xbf16>
    %23 = vector.shape_cast %22 : vector<1x16x32xbf16> to vector<1x16x32xbf16>
    %24 = vector.broadcast %23 : vector<1x16x32xbf16> to vector<2x16x32xbf16>
    %c0_12 = arith.constant 0 : index
    %c0_13 = arith.constant 0 : index
    %c0_14 = arith.constant 0 : index
    %c0_15 = arith.constant 0 : index
    %25 = vector.load %arg7[%c0_12, %c0_13, %c0_14, %c0_15] : memref<2x2x32x48xbf16, #tpu.memory_space<vmem>>, vector<1x2x32x48xbf16>
    %26 = vector.shape_cast %25 : vector<1x2x32x48xbf16> to vector<2x32x48xbf16>
    "tpu.trace_start"() <{level = 10 : i32, message = "hsd,hdf->hsf"}> : () -> ()
    %cst_16 = arith.constant dense<0.000000e+00> : vector<2x16x48xf32>
    %27 = tpu.matmul %24, %26, %cst_16 {dimension_numbers = #tpu.dot_dimension_numbers<[2], [1], [1], [2], [0, 0, 0, 1, 1, 2], [0], [0]>} : vector<2x16x32xbf16>, vector<2x32x48xbf16>, vector<2x16x48xf32> -> vector<2x16x48xf32>
    "tpu.trace_stop"() : () -> ()
    %28 = vector.extract_strided_slice %27 {offsets = [0, 0, 0], sizes = [2, 16, 16], strides = [1, 1, 1]} : vector<2x16x48xf32> to vector<2x16x16xf32>
    %29 = vector.extract_strided_slice %27 {offsets = [0, 0, 16], sizes = [2, 16, 16], strides = [1, 1, 1]} : vector<2x16x48xf32> to vector<2x16x16xf32>
    %30 = vector.extract_strided_slice %27 {offsets = [0, 0, 32], sizes = [2, 16, 16], strides = [1, 1, 1]} : vector<2x16x48xf32> to vector<2x16x16xf32>
    %31 = vector.broadcast %2 : vector<1x16x16xf32> to vector<2x16x16xf32>
    %32 = arith.mulf %28, %31 : vector<2x16x16xf32>
    %c8_i32 = arith.constant 8 : i32
    %33 = tpu.dynamic_rotate %28 by %c8_i32 dim 2 : vector<2x16x16xf32>, i32 -> vector<2x16x16xf32>
    %34 = vector.broadcast %4 : vector<1x16x16xf32> to vector<2x16x16xf32>
    %35 = arith.mulf %33, %34 : vector<2x16x16xf32>
    %36 = arith.addf %32, %35 : vector<2x16x16xf32>
    %cst_17 = arith.constant 2.500000e-01 : f32
    %37 = vector.broadcast %cst_17 : f32 to vector<2x16x16xf32>
    %38 = arith.mulf %36, %37 : vector<2x16x16xf32>
    %39 = vector.broadcast %2 : vector<1x16x16xf32> to vector<2x16x16xf32>
    %40 = arith.mulf %29, %39 : vector<2x16x16xf32>
    %c8_i32_18 = arith.constant 8 : i32
    %41 = tpu.dynamic_rotate %29 by %c8_i32_18 dim 2 : vector<2x16x16xf32>, i32 -> vector<2x16x16xf32>
    %42 = vector.broadcast %4 : vector<1x16x16xf32> to vector<2x16x16xf32>
    %43 = arith.mulf %41, %42 : vector<2x16x16xf32>
    %44 = arith.addf %40, %43 : vector<2x16x16xf32>
    %45 = arith.truncf %38 : vector<2x16x16xf32> to vector<2x16x16xbf16>
    %46 = arith.truncf %44 : vector<2x16x16xf32> to vector<2x16x16xbf16>
    "tpu.trace_start"() <{level = 10 : i32, message = "hqd,hkd->hqk"}> : () -> ()
    %cst_19 = arith.constant dense<0.000000e+00> : vector<2x16x16xf32>
    %47 = tpu.matmul %45, %46, %cst_19 {dimension_numbers = #tpu.dot_dimension_numbers<[2], [2], [1], [1], [0, 0, 0, 1, 1, 1], [0], [0]>} : vector<2x16x16xbf16>, vector<2x16x16xbf16>, vector<2x16x16xf32> -> vector<2x16x16xf32>
    "tpu.trace_stop"() : () -> ()
    %48 = vector.broadcast %6 : vector<1x16x16xf32> to vector<2x16x16xf32>
    %49 = arith.addf %47, %48 : vector<2x16x16xf32>
    %cst_20 = arith.constant dense<0xFF800000> : vector<2x16xf32>
    %50 = vector.multi_reduction <maximumf>, %49, %cst_20 [2] : vector<2x16x16xf32> to vector<2x16xf32>
    %51 = vector.shape_cast %50 : vector<2x16xf32> to vector<2x16x1xf32>
    %52 = vector.broadcast %51 : vector<2x16x1xf32> to vector<2x16x16xf32>
    %53 = arith.subf %49, %52 : vector<2x16x16xf32>
    %54 = math.exp %53 : vector<2x16x16xf32>
    %cst_21 = arith.constant dense<0.000000e+00> : vector<2x16xf32>
    %55 = vector.multi_reduction <add>, %54, %cst_21 [2] : vector<2x16x16xf32> to vector<2x16xf32>
    %56 = vector.shape_cast %55 : vector<2x16xf32> to vector<2x16x1xf32>
    %57 = tpu.reciprocal %56 {approx = true} : vector<2x16x1xf32> -> vector<2x16x1xf32>
    %58 = arith.truncf %54 : vector<2x16x16xf32> to vector<2x16x16xbf16>
    %59 = arith.truncf %30 : vector<2x16x16xf32> to vector<2x16x16xbf16>
    "tpu.trace_start"() <{level = 10 : i32, message = "hqk,hkd->hqd"}> : () -> ()
    %cst_22 = arith.constant dense<0.000000e+00> : vector<2x16x16xf32>
    %60 = tpu.matmul %58, %59, %cst_22 {dimension_numbers = #tpu.dot_dimension_numbers<[2], [1], [1], [2], [0, 0, 0, 1, 1, 2], [0], [0]>} : vector<2x16x16xbf16>, vector<2x16x16xbf16>, vector<2x16x16xf32> -> vector<2x16x16xf32>
    "tpu.trace_stop"() : () -> ()
    %61 = vector.broadcast %57 : vector<2x16x1xf32> to vector<2x16x16xf32>
    %62 = arith.mulf %60, %61 : vector<2x16x16xf32>
    %63 = arith.truncf %62 : vector<2x16x16xf32> to vector<2x16x16xbf16>
    %c0_23 = arith.constant 0 : index
    %c0_24 = arith.constant 0 : index
    %c0_25 = arith.constant 0 : index
    %c0_26 = arith.constant 0 : index
    %64 = vector.load %arg8[%c0_23, %c0_24, %c0_25, %c0_26] : memref<2x2x16x32xbf16, #tpu.memory_space<vmem>>, vector<1x2x16x32xbf16>
    %65 = vector.shape_cast %64 : vector<1x2x16x32xbf16> to vector<2x16x32xbf16>
    "tpu.trace_start"() <{level = 10 : i32, message = "hsd,hdf->hsf"}> : () -> ()
    %cst_27 = arith.constant dense<0.000000e+00> : vector<2x16x32xf32>
    %66 = tpu.matmul %63, %65, %cst_27 {dimension_numbers = #tpu.dot_dimension_numbers<[2], [1], [1], [2], [0, 0, 0, 1, 1, 2], [0], [0]>} : vector<2x16x16xbf16>, vector<2x16x32xbf16>, vector<2x16x32xf32> -> vector<2x16x32xf32>
    "tpu.trace_stop"() : () -> ()
    %cst_28 = arith.constant dense<0.000000e+00> : vector<16x32xf32>
    %67 = vector.multi_reduction <add>, %66, %cst_28 [0] : vector<2x16x32xf32> to vector<16x32xf32>
    %68 = arith.addf %0, %67 : vector<16x32xf32>
    %c0_29 = arith.constant 0 : index
    %c0_30 = arith.constant 0 : index
    %c0_31 = arith.constant 0 : index
    %69 = vector.load %arg6[%c0_29, %c0_30, %c0_31] : memref<2x1x32xf32, #tpu.memory_space<vmem>>, vector<1x1x32xf32>
    %70 = vector.shape_cast %69 : vector<1x1x32xf32> to vector<1x32xf32>
    %71 = arith.mulf %68, %68 : vector<16x32xf32>
    %cst_32 = arith.constant dense<0.000000e+00> : vector<16xf32>
    %72 = vector.multi_reduction <add>, %71, %cst_32 [1] : vector<16x32xf32> to vector<16xf32>
    %73 = vector.shape_cast %72 : vector<16xf32> to vector<16x1xf32>
    %cst_33 = arith.constant 3.200000e+01 : f32
    %74 = vector.broadcast %cst_33 : f32 to vector<16x1xf32>
    %75 = arith.divf %73, %74 : vector<16x1xf32>
    %cst_34 = arith.constant 9.99999997E-7 : f32
    %76 = vector.broadcast %cst_34 : f32 to vector<16x1xf32>
    %77 = arith.addf %75, %76 : vector<16x1xf32>
    %78 = math.rsqrt %77 : vector<16x1xf32>
    %79 = vector.broadcast %78 : vector<16x1xf32> to vector<16x32xf32>
    %80 = arith.mulf %68, %79 : vector<16x32xf32>
    %81 = vector.broadcast %70 : vector<1x32xf32> to vector<16x32xf32>
    %82 = arith.mulf %80, %81 : vector<16x32xf32>
    %83 = arith.truncf %82 : vector<16x32xf32> to vector<16x32xbf16>
    %c0_35 = arith.constant 0 : index
    %c0_36 = arith.constant 0 : index
    %c0_37 = arith.constant 0 : index
    %84 = vector.load %arg9[%c0_35, %c0_36, %c0_37] : memref<2x32x128xbf16, #tpu.memory_space<vmem>>, vector<1x32x128xbf16>
    %85 = vector.shape_cast %84 : vector<1x32x128xbf16> to vector<32x128xbf16>
    %cst_38 = arith.constant dense<0.000000e+00> : vector<16x128xf32>
    %86 = tpu.matmul %83, %85, %cst_38 {dimension_numbers = #tpu.dot_dimension_numbers<[1], [0], [0], [1], [0, 0, 1, 1], [], []>} : vector<16x32xbf16>, vector<32x128xbf16>, vector<16x128xf32> -> vector<16x128xf32>
    %87 = vector.extract_strided_slice %86 {offsets = [0, 0], sizes = [16, 64], strides = [1, 1]} : vector<16x128xf32> to vector<16x64xf32>
    %88 = vector.extract_strided_slice %86 {offsets = [0, 64], sizes = [16, 64], strides = [1, 1]} : vector<16x128xf32> to vector<16x64xf32>
    %89 = arith.negf %87 : vector<16x64xf32>
    %90 = math.exp %89 : vector<16x64xf32>
    %cst_39 = arith.constant 1.000000e+00 : f32
    %91 = vector.broadcast %cst_39 : f32 to vector<16x64xf32>
    %92 = arith.addf %91, %90 : vector<16x64xf32>
    %93 = arith.divf %91, %92 : vector<16x64xf32>
    %94 = arith.mulf %87, %93 : vector<16x64xf32>
    %95 = arith.mulf %94, %88 : vector<16x64xf32>
    %96 = arith.truncf %95 : vector<16x64xf32> to vector<16x64xbf16>
    %c0_40 = arith.constant 0 : index
    %c0_41 = arith.constant 0 : index
    %c0_42 = arith.constant 0 : index
    %97 = vector.load %arg10[%c0_40, %c0_41, %c0_42] : memref<2x64x32xbf16, #tpu.memory_space<vmem>>, vector<1x64x32xbf16>
    %98 = vector.shape_cast %97 : vector<1x64x32xbf16> to vector<64x32xbf16>
    %cst_43 = arith.constant dense<0.000000e+00> : vector<16x32xf32>
    %99 = tpu.matmul %96, %98, %cst_43 {dimension_numbers = #tpu.dot_dimension_numbers<[1], [0], [0], [1], [0, 0, 1, 1], [], []>} : vector<16x64xbf16>, vector<64x32xbf16>, vector<16x32xf32> -> vector<16x32xf32>
    %100 = arith.addf %68, %99 : vector<16x32xf32>
    %c1 = arith.constant 1 : index
    %c0_44 = arith.constant 0 : index
    %c0_45 = arith.constant 0 : index
    %101 = vector.load %arg5[%c1, %c0_44, %c0_45] : memref<2x1x32xf32, #tpu.memory_space<vmem>>, vector<1x1x32xf32>
    %102 = vector.shape_cast %101 : vector<1x1x32xf32> to vector<1x32xf32>
    %103 = arith.mulf %100, %100 : vector<16x32xf32>
    %cst_46 = arith.constant dense<0.000000e+00> : vector<16xf32>
    %104 = vector.multi_reduction <add>, %103, %cst_46 [1] : vector<16x32xf32> to vector<16xf32>
    %105 = vector.shape_cast %104 : vector<16xf32> to vector<16x1xf32>
    %cst_47 = arith.constant 3.200000e+01 : f32
    %106 = vector.broadcast %cst_47 : f32 to vector<16x1xf32>
    %107 = arith.divf %105, %106 : vector<16x1xf32>
    %cst_48 = arith.constant 9.99999997E-7 : f32
    %108 = vector.broadcast %cst_48 : f32 to vector<16x1xf32>
    %109 = arith.addf %107, %108 : vector<16x1xf32>
    %110 = math.rsqrt %109 : vector<16x1xf32>
    %111 = vector.broadcast %110 : vector<16x1xf32> to vector<16x32xf32>
    %112 = arith.mulf %100, %111 : vector<16x32xf32>
    %113 = vector.broadcast %102 : vector<1x32xf32> to vector<16x32xf32>
    %114 = arith.mulf %112, %113 : vector<16x32xf32>
    %115 = arith.truncf %114 : vector<16x32xf32> to vector<16x32xbf16>
    %116 = vector.shape_cast %115 : vector<16x32xbf16> to vector<1x16x32xbf16>
    %117 = vector.shape_cast %116 : vector<1x16x32xbf16> to vector<1x16x32xbf16>
    %118 = vector.broadcast %117 : vector<1x16x32xbf16> to vector<2x16x32xbf16>
    %c1_49 = arith.constant 1 : index
    %c0_50 = arith.constant 0 : index
    %c0_51 = arith.constant 0 : index
    %c0_52 = arith.constant 0 : index
    %119 = vector.load %arg7[%c1_49, %c0_50, %c0_51, %c0_52] : memref<2x2x32x48xbf16, #tpu.memory_space<vmem>>, vector<1x2x32x48xbf16>
    %120 = vector.shape_cast %119 : vector<1x2x32x48xbf16> to vector<2x32x48xbf16>
    "tpu.trace_start"() <{level = 10 : i32, message = "hsd,hdf->hsf"}> : () -> ()
    %cst_53 = arith.constant dense<0.000000e+00> : vector<2x16x48xf32>
    %121 = tpu.matmul %118, %120, %cst_53 {dimension_numbers = #tpu.dot_dimension_numbers<[2], [1], [1], [2], [0, 0, 0, 1, 1, 2], [0], [0]>} : vector<2x16x32xbf16>, vector<2x32x48xbf16>, vector<2x16x48xf32> -> vector<2x16x48xf32>
    "tpu.trace_stop"() : () -> ()
    %122 = vector.extract_strided_slice %121 {offsets = [0, 0, 0], sizes = [2, 16, 16], strides = [1, 1, 1]} : vector<2x16x48xf32> to vector<2x16x16xf32>
    %123 = vector.extract_strided_slice %121 {offsets = [0, 0, 16], sizes = [2, 16, 16], strides = [1, 1, 1]} : vector<2x16x48xf32> to vector<2x16x16xf32>
    %124 = vector.extract_strided_slice %121 {offsets = [0, 0, 32], sizes = [2, 16, 16], strides = [1, 1, 1]} : vector<2x16x48xf32> to vector<2x16x16xf32>
    %125 = vector.broadcast %2 : vector<1x16x16xf32> to vector<2x16x16xf32>
    %126 = arith.mulf %122, %125 : vector<2x16x16xf32>
    %c8_i32_54 = arith.constant 8 : i32
    %127 = tpu.dynamic_rotate %122 by %c8_i32_54 dim 2 : vector<2x16x16xf32>, i32 -> vector<2x16x16xf32>
    %128 = vector.broadcast %4 : vector<1x16x16xf32> to vector<2x16x16xf32>
    %129 = arith.mulf %127, %128 : vector<2x16x16xf32>
    %130 = arith.addf %126, %129 : vector<2x16x16xf32>
    %cst_55 = arith.constant 2.500000e-01 : f32
    %131 = vector.broadcast %cst_55 : f32 to vector<2x16x16xf32>
    %132 = arith.mulf %130, %131 : vector<2x16x16xf32>
    %133 = vector.broadcast %2 : vector<1x16x16xf32> to vector<2x16x16xf32>
    %134 = arith.mulf %123, %133 : vector<2x16x16xf32>
    %c8_i32_56 = arith.constant 8 : i32
    %135 = tpu.dynamic_rotate %123 by %c8_i32_56 dim 2 : vector<2x16x16xf32>, i32 -> vector<2x16x16xf32>
    %136 = vector.broadcast %4 : vector<1x16x16xf32> to vector<2x16x16xf32>
    %137 = arith.mulf %135, %136 : vector<2x16x16xf32>
    %138 = arith.addf %134, %137 : vector<2x16x16xf32>
    %139 = arith.truncf %132 : vector<2x16x16xf32> to vector<2x16x16xbf16>
    %140 = arith.truncf %138 : vector<2x16x16xf32> to vector<2x16x16xbf16>
    "tpu.trace_start"() <{level = 10 : i32, message = "hqd,hkd->hqk"}> : () -> ()
    %cst_57 = arith.constant dense<0.000000e+00> : vector<2x16x16xf32>
    %141 = tpu.matmul %139, %140, %cst_57 {dimension_numbers = #tpu.dot_dimension_numbers<[2], [2], [1], [1], [0, 0, 0, 1, 1, 1], [0], [0]>} : vector<2x16x16xbf16>, vector<2x16x16xbf16>, vector<2x16x16xf32> -> vector<2x16x16xf32>
    "tpu.trace_stop"() : () -> ()
    %142 = vector.broadcast %6 : vector<1x16x16xf32> to vector<2x16x16xf32>
    %143 = arith.addf %141, %142 : vector<2x16x16xf32>
    %cst_58 = arith.constant dense<0xFF800000> : vector<2x16xf32>
    %144 = vector.multi_reduction <maximumf>, %143, %cst_58 [2] : vector<2x16x16xf32> to vector<2x16xf32>
    %145 = vector.shape_cast %144 : vector<2x16xf32> to vector<2x16x1xf32>
    %146 = vector.broadcast %145 : vector<2x16x1xf32> to vector<2x16x16xf32>
    %147 = arith.subf %143, %146 : vector<2x16x16xf32>
    %148 = math.exp %147 : vector<2x16x16xf32>
    %cst_59 = arith.constant dense<0.000000e+00> : vector<2x16xf32>
    %149 = vector.multi_reduction <add>, %148, %cst_59 [2] : vector<2x16x16xf32> to vector<2x16xf32>
    %150 = vector.shape_cast %149 : vector<2x16xf32> to vector<2x16x1xf32>
    %151 = tpu.reciprocal %150 {approx = true} : vector<2x16x1xf32> -> vector<2x16x1xf32>
    %152 = arith.truncf %148 : vector<2x16x16xf32> to vector<2x16x16xbf16>
    %153 = arith.truncf %124 : vector<2x16x16xf32> to vector<2x16x16xbf16>
    "tpu.trace_start"() <{level = 10 : i32, message = "hqk,hkd->hqd"}> : () -> ()
    %cst_60 = arith.constant dense<0.000000e+00> : vector<2x16x16xf32>
    %154 = tpu.matmul %152, %153, %cst_60 {dimension_numbers = #tpu.dot_dimension_numbers<[2], [1], [1], [2], [0, 0, 0, 1, 1, 2], [0], [0]>} : vector<2x16x16xbf16>, vector<2x16x16xbf16>, vector<2x16x16xf32> -> vector<2x16x16xf32>
    "tpu.trace_stop"() : () -> ()
    %155 = vector.broadcast %151 : vector<2x16x1xf32> to vector<2x16x16xf32>
    %156 = arith.mulf %154, %155 : vector<2x16x16xf32>
    %157 = arith.truncf %156 : vector<2x16x16xf32> to vector<2x16x16xbf16>
    %c1_61 = arith.constant 1 : index
    %c0_62 = arith.constant 0 : index
    %c0_63 = arith.constant 0 : index
    %c0_64 = arith.constant 0 : index
    %158 = vector.load %arg8[%c1_61, %c0_62, %c0_63, %c0_64] : memref<2x2x16x32xbf16, #tpu.memory_space<vmem>>, vector<1x2x16x32xbf16>
    %159 = vector.shape_cast %158 : vector<1x2x16x32xbf16> to vector<2x16x32xbf16>
    "tpu.trace_start"() <{level = 10 : i32, message = "hsd,hdf->hsf"}> : () -> ()
    %cst_65 = arith.constant dense<0.000000e+00> : vector<2x16x32xf32>
    %160 = tpu.matmul %157, %159, %cst_65 {dimension_numbers = #tpu.dot_dimension_numbers<[2], [1], [1], [2], [0, 0, 0, 1, 1, 2], [0], [0]>} : vector<2x16x16xbf16>, vector<2x16x32xbf16>, vector<2x16x32xf32> -> vector<2x16x32xf32>
    "tpu.trace_stop"() : () -> ()
    %cst_66 = arith.constant dense<0.000000e+00> : vector<16x32xf32>
    %161 = vector.multi_reduction <add>, %160, %cst_66 [0] : vector<2x16x32xf32> to vector<16x32xf32>
    %162 = arith.addf %100, %161 : vector<16x32xf32>
    %c1_67 = arith.constant 1 : index
    %c0_68 = arith.constant 0 : index
    %c0_69 = arith.constant 0 : index
    %163 = vector.load %arg6[%c1_67, %c0_68, %c0_69] : memref<2x1x32xf32, #tpu.memory_space<vmem>>, vector<1x1x32xf32>
    %164 = vector.shape_cast %163 : vector<1x1x32xf32> to vector<1x32xf32>
    %165 = arith.mulf %162, %162 : vector<16x32xf32>
    %cst_70 = arith.constant dense<0.000000e+00> : vector<16xf32>
    %166 = vector.multi_reduction <add>, %165, %cst_70 [1] : vector<16x32xf32> to vector<16xf32>
    %167 = vector.shape_cast %166 : vector<16xf32> to vector<16x1xf32>
    %cst_71 = arith.constant 3.200000e+01 : f32
    %168 = vector.broadcast %cst_71 : f32 to vector<16x1xf32>
    %169 = arith.divf %167, %168 : vector<16x1xf32>
    %cst_72 = arith.constant 9.99999997E-7 : f32
    %170 = vector.broadcast %cst_72 : f32 to vector<16x1xf32>
    %171 = arith.addf %169, %170 : vector<16x1xf32>
    %172 = math.rsqrt %171 : vector<16x1xf32>
    %173 = vector.broadcast %172 : vector<16x1xf32> to vector<16x32xf32>
    %174 = arith.mulf %162, %173 : vector<16x32xf32>
    %175 = vector.broadcast %164 : vector<1x32xf32> to vector<16x32xf32>
    %176 = arith.mulf %174, %175 : vector<16x32xf32>
    %177 = arith.truncf %176 : vector<16x32xf32> to vector<16x32xbf16>
    %c1_73 = arith.constant 1 : index
    %c0_74 = arith.constant 0 : index
    %c0_75 = arith.constant 0 : index
    %178 = vector.load %arg9[%c1_73, %c0_74, %c0_75] : memref<2x32x128xbf16, #tpu.memory_space<vmem>>, vector<1x32x128xbf16>
    %179 = vector.shape_cast %178 : vector<1x32x128xbf16> to vector<32x128xbf16>
    %cst_76 = arith.constant dense<0.000000e+00> : vector<16x128xf32>
    %180 = tpu.matmul %177, %179, %cst_76 {dimension_numbers = #tpu.dot_dimension_numbers<[1], [0], [0], [1], [0, 0, 1, 1], [], []>} : vector<16x32xbf16>, vector<32x128xbf16>, vector<16x128xf32> -> vector<16x128xf32>
    %181 = vector.extract_strided_slice %180 {offsets = [0, 0], sizes = [16, 64], strides = [1, 1]} : vector<16x128xf32> to vector<16x64xf32>
    %182 = vector.extract_strided_slice %180 {offsets = [0, 64], sizes = [16, 64], strides = [1, 1]} : vector<16x128xf32> to vector<16x64xf32>
    %183 = arith.negf %181 : vector<16x64xf32>
    %184 = math.exp %183 : vector<16x64xf32>
    %cst_77 = arith.constant 1.000000e+00 : f32
    %185 = vector.broadcast %cst_77 : f32 to vector<16x64xf32>
    %186 = arith.addf %185, %184 : vector<16x64xf32>
    %187 = arith.divf %185, %186 : vector<16x64xf32>
    %188 = arith.mulf %181, %187 : vector<16x64xf32>
    %189 = arith.mulf %188, %182 : vector<16x64xf32>
    %190 = arith.truncf %189 : vector<16x64xf32> to vector<16x64xbf16>
    %c1_78 = arith.constant 1 : index
    %c0_79 = arith.constant 0 : index
    %c0_80 = arith.constant 0 : index
    %191 = vector.load %arg10[%c1_78, %c0_79, %c0_80] : memref<2x64x32xbf16, #tpu.memory_space<vmem>>, vector<1x64x32xbf16>
    %192 = vector.shape_cast %191 : vector<1x64x32xbf16> to vector<64x32xbf16>
    %cst_81 = arith.constant dense<0.000000e+00> : vector<16x32xf32>
    %193 = tpu.matmul %190, %192, %cst_81 {dimension_numbers = #tpu.dot_dimension_numbers<[1], [0], [0], [1], [0, 0, 1, 1], [], []>} : vector<16x64xbf16>, vector<64x32xbf16>, vector<16x32xf32> -> vector<16x32xf32>
    %194 = arith.addf %162, %193 : vector<16x32xf32>
    %c0_82 = arith.constant 0 : index
    %c0_83 = arith.constant 0 : index
    %195 = vector.load %arg11[%c0_82, %c0_83] : memref<1x32xf32, #tpu.memory_space<vmem>>, vector<1x32xf32>
    %196 = arith.mulf %194, %194 : vector<16x32xf32>
    %cst_84 = arith.constant dense<0.000000e+00> : vector<16xf32>
    %197 = vector.multi_reduction <add>, %196, %cst_84 [1] : vector<16x32xf32> to vector<16xf32>
    %198 = vector.shape_cast %197 : vector<16xf32> to vector<16x1xf32>
    %cst_85 = arith.constant 3.200000e+01 : f32
    %199 = vector.broadcast %cst_85 : f32 to vector<16x1xf32>
    %200 = arith.divf %198, %199 : vector<16x1xf32>
    %cst_86 = arith.constant 9.99999997E-7 : f32
    %201 = vector.broadcast %cst_86 : f32 to vector<16x1xf32>
    %202 = arith.addf %200, %201 : vector<16x1xf32>
    %203 = math.rsqrt %202 : vector<16x1xf32>
    %204 = vector.broadcast %203 : vector<16x1xf32> to vector<16x32xf32>
    %205 = arith.mulf %194, %204 : vector<16x32xf32>
    %206 = vector.broadcast %195 : vector<1x32xf32> to vector<16x32xf32>
    %207 = arith.mulf %205, %206 : vector<16x32xf32>
    %208 = arith.truncf %207 : vector<16x32xf32> to vector<16x32xbf16>
    %c0_87 = arith.constant 0 : index
    %c0_88 = arith.constant 0 : index
    %209 = vector.load %arg12[%c0_87, %c0_88] : memref<32x128xbf16, #tpu.memory_space<vmem>>, vector<32x128xbf16>
    %cst_89 = arith.constant dense<0.000000e+00> : vector<16x128xf32>
    %210 = tpu.matmul %208, %209, %cst_89 {dimension_numbers = #tpu.dot_dimension_numbers<[1], [0], [0], [1], [0, 0, 1, 1], [], []>} : vector<16x32xbf16>, vector<32x128xbf16>, vector<16x128xf32> -> vector<16x128xf32>
    %c0_90 = arith.constant 0 : index
    %c0_91 = arith.constant 0 : index
    %211 = vector.load %arg13[%c0_90, %c0_91] : memref<16x128xf32, #tpu.memory_space<vmem>>, vector<16x128xf32>
    tpu.vector_store %arg13[%c0_90, %c0_91], %210 {strides = array<i32>} : memref<16x128xf32, #tpu.memory_space<vmem>>, vector<16x128xf32>,
    return
  }
  func.func @transform_0(%arg0: i32) -> (i32, i32) {
    %c0_i32 = arith.constant 0 : i32
    %c0_i32_0 = arith.constant 0 : i32
    %c0_i32_1 = arith.constant 0 : i32
    return %c0_i32, %c0_i32_0 : i32, i32
  }
  func.func @transform_1(%arg0: i32) -> (i32, i32) {
    %c0_i32 = arith.constant 0 : i32
    %c0_i32_0 = arith.constant 0 : i32
    %c0_i32_1 = arith.constant 0 : i32
    return %c0_i32, %c0_i32_0 : i32, i32
  }
  func.func @transform_2(%arg0: i32) -> (i32, i32) {
    %c0_i32 = arith.constant 0 : i32
    %c0_i32_0 = arith.constant 0 : i32
    %c0_i32_1 = arith.constant 0 : i32
    return %c0_i32, %c0_i32_0 : i32, i32
  }
  func.func @transform_3(%arg0: i32) -> (i32, i32) {
    %c0_i32 = arith.constant 0 : i32
    %c0_i32_0 = arith.constant 0 : i32
    %c0_i32_1 = arith.constant 0 : i32
    return %c0_i32, %c0_i32_0 : i32, i32
  }
  func.func @transform_4(%arg0: i32) -> (i32, i32, i32) {
    %c0_i32 = arith.constant 0 : i32
    %c0_i32_0 = arith.constant 0 : i32
    %c0_i32_1 = arith.constant 0 : i32
    %c0_i32_2 = arith.constant 0 : i32
    return %c0_i32, %c0_i32_0, %c0_i32_1 : i32, i32, i32
  }
  func.func @transform_5(%arg0: i32) -> (i32, i32, i32) {
    %c0_i32 = arith.constant 0 : i32
    %c0_i32_0 = arith.constant 0 : i32
    %c0_i32_1 = arith.constant 0 : i32
    %c0_i32_2 = arith.constant 0 : i32
    return %c0_i32, %c0_i32_0, %c0_i32_1 : i32, i32, i32
  }
  func.func @transform_6(%arg0: i32) -> (i32, i32, i32, i32) {
    %c0_i32 = arith.constant 0 : i32
    %c0_i32_0 = arith.constant 0 : i32
    %c0_i32_1 = arith.constant 0 : i32
    %c0_i32_2 = arith.constant 0 : i32
    %c0_i32_3 = arith.constant 0 : i32
    return %c0_i32, %c0_i32_0, %c0_i32_1, %c0_i32_2 : i32, i32, i32, i32
  }
  func.func @transform_7(%arg0: i32) -> (i32, i32, i32, i32) {
    %c0_i32 = arith.constant 0 : i32
    %c0_i32_0 = arith.constant 0 : i32
    %c0_i32_1 = arith.constant 0 : i32
    %c0_i32_2 = arith.constant 0 : i32
    %c0_i32_3 = arith.constant 0 : i32
    return %c0_i32, %c0_i32_0, %c0_i32_1, %c0_i32_2 : i32, i32, i32, i32
  }
  func.func @transform_8(%arg0: i32) -> (i32, i32, i32) {
    %c0_i32 = arith.constant 0 : i32
    %c0_i32_0 = arith.constant 0 : i32
    %c0_i32_1 = arith.constant 0 : i32
    %c0_i32_2 = arith.constant 0 : i32
    return %c0_i32, %c0_i32_0, %c0_i32_1 : i32, i32, i32
  }
  func.func @transform_9(%arg0: i32) -> (i32, i32, i32) {
    %c0_i32 = arith.constant 0 : i32
    %c0_i32_0 = arith.constant 0 : i32
    %c0_i32_1 = arith.constant 0 : i32
    %c0_i32_2 = arith.constant 0 : i32
    return %c0_i32, %c0_i32_0, %c0_i32_1 : i32, i32, i32
  }
  func.func @transform_10(%arg0: i32) -> (i32, i32) {
    %c0_i32 = arith.constant 0 : i32
    %c0_i32_0 = arith.constant 0 : i32
    %c0_i32_1 = arith.constant 0 : i32
    return %c0_i32, %c0_i32_0 : i32, i32
  }
  func.func @transform_11(%arg0: i32) -> (i32, i32) {
    %c0_i32 = arith.constant 0 : i32
    %c0_i32_0 = arith.constant 0 : i32
    %c0_i32_1 = arith.constant 0 : i32
    return %c0_i32, %c0_i32_0 : i32, i32
  }
  func.func @transform_12(%arg0: i32) -> (i32, i32) {
    %c0_i32 = arith.constant 0 : i32
    %c0_i32_0 = arith.constant 0 : i32
    %c0_i32_1 = arith.constant 0 : i32
    return %c0_i32, %c0_i32_0 : i32, i32
  }
}

</mosaic_0001>

<bundles_post_ra>
// kernel: causal_lm_forward.1
= control target key start
LH: loop header
LB: loop body
LE: loop exit
PB: predicated region body
PF: predicated region fallthrough
CT: control target
= control target key end

     0   :  { %vm54_vm0 = vcmask 261120   ;;  %s2869_s0 = inlined_call_operand.vmem [shape: f32[16,32], index: 0, kind: input, shape index: {}]   ;;  %s2870_s1 = inlined_call_operand.vmem [shape: f32[16,16], index: 1, kind: input, shape index: {}]   ;;  %s2871_s2 = inlined_call_operand.vmem [shape: f32[16,16], index: 2, kind: input, shape index: {}]   ;;  %s2872_s3 = inlined_call_operand.vmem [shape: f32[16,16], index: 3, kind: input, shape index: {}]   ;;  %s2873_s4 = inlined_call_operand.vmem [shape: f32[2,1,32], index: 4, kind: input, shape index: {}]   ;;  %s2874_s5 = inlined_call_operand.vmem [shape: f32[2,1,32], index: 5, kind: input, shape index: {}]   ;;  %s2875_s6 = inlined_call_operand.vmem [shape: bf16[2,2,32,48], index: 6, kind: input, shape index: {}]   ;;  %s2876_s7 = inlined_call_operand.vmem [shape: bf16[2,2,16,32], index: 7, kind: input, shape index: {}]   ;;  %s2877_s8 = inlined_call_operand.vmem [shape: bf16[2,32,128], index: 8, kind: input, shape index: {}]   ;;  %s2878_s9 = inlined_call_operand.vmem [shape: bf16[2,64,32], index: 9, kind: input, shape index: {}]   ;;  %s2879_s10 = inlined_call_operand.vmem [shape: f32[1,32], index: 10, kind: input, shape index: {}]   ;;  %s2880_s11 = inlined_call_operand.vmem [shape: bf16[32,128], index: 11, kind: input, shape index: {}]   ;;  %s2881_s12 = inlined_call_operand.hbm [shape: f32[16,128], index: 12, kind: output, shape index: {}]  }
   0x1   :  { %v2313_v0 = vld [vmem:[%s2869_s0] sm:$0xff]  ;;  %v2318_v1 = vld [vmem:[%s2869_s0 + $0x8] sm:$0xff] }
   0x2   :  { %v52_v2 = vmul.f32 %v2313_v0, %v2313_v0  ;;  %v53_v3 = vmul.f32 %v2318_v1, %v2318_v1 }
   0x4   :  { %v55_v4 = vsel %vm54_vm0, %v52_v2, 0.0  ;;  %v58_v5 = vsel %vm54_vm0, %v53_v3, 0.0 }
   0x5   :  { %56 = vadd.xlane.f32.xlu0 %v55_v4 }
   0x9   :  { %59 = vadd.xlane.f32.xlu0 %v58_v5 }
   0xa   :  { %17 = vsyncpa [#allocation3], 0  ;;  %v2117_v6 = vld [vmem:[%s2875_s6] sm:$0xff]   ;;  %v2118_v7 = vld [vmem:[%s2875_s6 + $0x10] sm:$0xff]   ;;  %v2235_v8 = vmov 0.0   ;;  %vm2236_vm1 = vmmov 0  }
   0xb   :  { %1955 = vmatprep.subr.bf16.mxu0 %v2235_v8  ;;  %1963 = vmatprep.subr.bf16.mxu1 %v2235_v8  ;;  %v2119_v9 = vld [vmem:[%s2875_s6 + $0x8] sm:$0xff]   ;;  %v2120_v10 = vld [vmem:[%s2875_s6 + $0x18] sm:$0xff]   ;;  %v1818_v20 = vld [vmem:[%s2873_s4] ss:$0 sm:$0xff]  ;;  %s2237_s16 = smov 112   ;;  %s2238_s19 = smov 8  }
   0xc   :  { %1956 = vmatpush3.bf16.msra.mxu0 %v2117_v6  ;;  %1964 = vmatpush3.bf16.msra.mxu1 %v2118_v7  ;;  %v48_v35 = vld [vmem:[%s2871_s2 + $0x8] sm:$0xff]  ;;  %s2239_s20 = smov 16   ;;  %v47_v40 = vld [vmem:[%s2871_s2] sm:$0xff]  ;;  %vm200_vm2 = vcmask 1047680   ;;  %vm344_vm3 = vcmask 130048   ;;  %s2242_s30 = smov 64  }
   0xd   :  { %1957 = vmatprep.subr.bf16.mxu0 %v2235_v8  ;;  %1965 = vmatprep.subr.bf16.mxu1 %v2235_v8  ;;  %v2406_v49 = vld [vmem:[%s2870_s1] sm:$0xff]  ;;  %v2417_v50 = vld [vmem:[%s2870_s1 + $0x8] sm:$0xff]  ;;  %s2240_s1 = smov 120   ;;  %vm843_vm4 = vcmask 523264  }
   0xe   :  { %1959 = vmatprep.mubr.msk.bf16.mxu0 %vm2236_vm1, %v2235_v8  ;;  %1967 = vmatprep.mubr.msk.bf16.mxu1 %vm2236_vm1, %v2235_v8 }
  0x10   :  { %1958 = vmatpush3.bf16.msra.mxu0 %v2119_v9  ;;  %1966 = vmatpush3.bf16.msra.mxu1 %v2120_v10 }
  0x11   :  { %1971 = vmatprep.subr.bf16.mxu0 %v2235_v8  ;;  %1977 = vmatprep.subr.bf16.mxu1 %v2235_v8 }
  0x92   :  { %v57_v11 = vpop.xlane.xlu0 %56 }
  0x93   :  { %v62_v12 = vmul.f32 0.03125, %v57_v11 }
  0x95   :  { %v64_v13 = vadd.f32 1e-06, %v62_v12 }
  0x96   :  { %v60_v14 = vpop.xlane.xlu0 %59 }
  0x97   :  { %2143 = vrsqrt.f32 %v64_v13  ;;  %v63_v15 = vmul.f32 0.03125, %v60_v14 }
  0x99   :  { %v65_v16 = vadd.f32 1e-06, %v63_v15 }
  0x9b   :  { %2145 = vrsqrt.f32 %v65_v16 }
  0xa1   :  { %v2144_v17 = vpop.eup %2143 }
  0xa2   :  { %v68_v18 = vmul.f32 %v2144_v17, %v2313_v0 }
  0xa4   :  { %v76_v22 = vmul.f32 %v1818_v20, %v68_v18 }
  0xa5   :  { %v2146_v19 = vpop.eup %2145 }
  0xa6   :  { %v69_v21 = vmul.f32 %v2146_v19, %v2318_v1 }
  0xa8   :  { %v77_v23 = vmul.f32 %v1818_v20, %v69_v21 }
  0xaa   :  { %v78_v24 = vpack.c.bf16 %v77_v23, %v76_v22 }
  0xac   :  { %1960 = vmatmul.mubr.msk.bf16.vlgmr.msra.gmra.mrb[0].mxu0 %vm54_vm0, %v78_v24  ;;  %1968 = vmatmul.mubr.msk.bf16.vlgmr.msra.gmra.mrb[0].mxu1 %vm54_vm0, %v78_v24 }
  0xad   :  { %1973 = vmatprep.mubr.msk.bf16.mxu0 %vm2236_vm1, %v2235_v8  ;;  %1979 = vmatprep.mubr.msk.bf16.mxu1 %vm2236_vm1, %v2235_v8 }
 0x17f   :  { %v2359_v25 = vpop.f32.mrb[0].mxu0  ;;  %v2361_v26 = vpop.f32.mrb[0].mxu1 }
 0x180   :  { %281 = vrot.lane.b32.xlu0 %v2361_v26, %s2237_s16  ;;  %v1969_v27 = vpop.f32.mrb[1].mxu1  ;;  %277 = vrot.lane.b32.xlu1 %v2359_v25, %s2237_s16  ;;  %v1961_v28 = vpop.f32.mrb[1].mxu0 }
 0x181   :  { %v2367_v29 = vpop.f32.mrb[2].mxu0  ;;  %v2369_v30 = vpop.f32.mrb[2].mxu1 }
 0x182   :  { %v1962_v31 = vpop.f32.mrb[3].mxu0  ;;  %v1970_v32 = vpop.f32.mrb[3].mxu1  ;;  %v485_v33 = vpack.c.bf16 %v2369_v30, %v2361_v26  ;;  %v484_v34 = vpack.c.bf16 %v2367_v29, %v2359_v25 }
 0x184   :  { %279 = vrot.lane.b32.xlu1 %v2367_v29, %s2237_s16  ;;  %229 = vrot.lane.b32.xlu0 %v48_v35, %s2238_s19 }
 0x188   :  { %283 = vrot.lane.b32.xlu1 %v2369_v30, %s2237_s16 }
 0x1f2   :  { %v278_v36 = vpop.permute.xlu1 %277  ;;  %v282_v37 = vpop.permute.xlu0 %281 }
 0x1f3   :  { %289 = vrot.lane.b32.xlu1 %v278_v36, %s2239_s20 }
 0x1f6   :  { %v280_v38 = vpop.permute.xlu1 %279  ;;  %v2423_v53 = vpop.permute.xlu0 %229 }
 0x1f7   :  { %295 = vrot.lane.b32.xlu1 %v282_v37, %s2239_s20 }
 0x1fa   :  { %v284_v39 = vpop.permute.xlu1 %283 }
 0x1fb   :  { %292 = vrot.lane.b32.xlu1 %v280_v38, %s2239_s20 }
 0x1ff   :  { %298 = vrot.lane.b32.xlu1 %v284_v39, %s2239_s20 }
 0x203   :  { %227 = vrot.lane.b32.xlu1 %v47_v40, %s2238_s19 }
 0x265   :  { %v290_v41 = vpop.permute.xlu1 %289 }
 0x266   :  { %v291_v42 = vsel %vm200_vm2, %v290_v41, %v278_v36 }
 0x267   :  { %301 = vrot.lane.b32.xlu1 %v291_v42, %s2239_s20 }
 0x269   :  { %v296_v43 = vpop.permute.xlu1 %295 }
 0x26a   :  { %v297_v44 = vsel %vm200_vm2, %v296_v43, %v282_v37 }
 0x26b   :  { %305 = vrot.lane.b32.xlu1 %v297_v44, %s2239_s20 }
 0x26d   :  { %v293_v45 = vpop.permute.xlu1 %292 }
 0x26e   :  { %v294_v46 = vsel %vm200_vm2, %v293_v45, %v280_v38 }
 0x26f   :  { %201 = vrot.lane.b32.xlu1 %v2359_v25, %s2239_s20  ;;  %303 = vrot.lane.b32.xlu0 %v294_v46, %s2239_s20 }
 0x271   :  { %v299_v47 = vpop.permute.xlu1 %298 }
 0x272   :  { %v300_v48 = vsel %vm200_vm2, %v299_v47, %v284_v39  ;;  %v196_v47 = vmul.f32 %v2359_v25, %v2406_v49 }
 0x273   :  { %207 = vrot.lane.b32.xlu1 %v2361_v26, %s2239_s20  ;;  %307 = vrot.lane.b32.xlu0 %v300_v48, %s2239_s20 }
 0x275   :  { %v2421_v51 = vpop.permute.xlu1 %227 }
 0x277   :  { %263 = vrot.lane.b32.xlu1 %v2406_v49, %s2239_s20  ;;  %204 = vrot.lane.b32.xlu0 %v2367_v29, %s2239_s20 }
 0x27b   :  { %210 = vrot.lane.b32.xlu0 %v2369_v30, %s2239_s20 }
 0x27f   :  { %265 = vrot.lane.b32.xlu0 %v2417_v50, %s2239_s20 }
 0x2d9   :  { %v302_v52 = vpop.permute.xlu1 %301 }
 0x2da   :  { %v309_v57 = vsel %vm200_vm2, %v302_v52, %v278_v36  ;;  %v197_v52 = vmul.f32 %v2367_v29, %v2417_v50 }
 0x2db   :  { %v313_v59 = vmul.f32 %v309_v57, %v2421_v51 }
 0x2dd   :  { %v306_v54 = vpop.permute.xlu1 %305 }
 0x2de   :  { %v311_v61 = vsel %vm200_vm2, %v306_v54, %v282_v37 }
 0x2df   :  { %v315_v62 = vmul.f32 %v311_v61, %v2421_v51 }
 0x2e1   :  { %v304_v55 = vpop.permute.xlu0 %303  ;;  %v202_v56 = vpop.permute.xlu1 %201 }
 0x2e2   :  { %v203_v58 = vsel %vm200_vm2, %v202_v56, %v2359_v25  ;;  %v310_v2 = vsel %vm200_vm2, %v304_v55, %v280_v38 }
 0x2e3   :  { %213 = vrot.lane.b32.xlu1 %v203_v58, %s2239_s20  ;;  %v314_v5 = vmul.f32 %v310_v2, %v2423_v53  ;;  %v198_v2 = vmul.f32 %v2361_v26, %v2406_v49 }
 0x2e5   :  { %v308_v60 = vpop.permute.xlu0 %307  ;;  %v208_v4 = vpop.permute.xlu1 %207 }
 0x2e6   :  { %v312_v6 = vsel %vm200_vm2, %v308_v60, %v284_v39  ;;  %v209_v7 = vsel %vm200_vm2, %v208_v4, %v2361_v26  ;;  %v199_v4 = vmul.f32 %v2369_v30, %v2417_v50 }
 0x2e7   :  { %321 = vrot.lane.b32.xlu1 %v313_v59, %s2238_s19  ;;  %v316_v9 = vmul.f32 %v312_v6, %v2423_v53 }
 0x2e9   :  { %v205_v63 = vpop.permute.xlu0 %204  ;;  %v2449_v12 = vpop.permute.xlu1 %263 }
 0x2ea   :  { %v206_v3 = vsel %vm200_vm2, %v205_v63, %v2367_v29  ;;  %v269_v22 = vmul.f32 %v2449_v12, %v2359_v25  ;;  %v271_v32 = vmul.f32 %v2449_v12, %v2361_v26 }
 0x2eb   :  { %215 = vrot.lane.b32.xlu0 %v206_v3, %s2239_s20  ;;  %325 = vrot.lane.b32.xlu1 %v315_v62, %s2238_s19 }
 0x2ed   :  { %v211_v10 = vpop.permute.xlu0 %210 }
 0x2ee   :  { %v212_v11 = vsel %vm200_vm2, %v211_v10, %v2369_v30 }
 0x2ef   :  { %323 = vrot.lane.b32.xlu0 %v314_v5, %s2238_s19  ;;  %217 = vrot.lane.b32.xlu1 %v209_v7, %s2239_s20 }
 0x2f1   :  { %v2454_v16 = vpop.permute.xlu0 %265 }
 0x2f2   :  { %v270_v23 = vmul.f32 %v2454_v16, %v2367_v29  ;;  %v272_v36 = vmul.f32 %v2454_v16, %v2369_v30 }
 0x2f3   :  { %327 = vrot.lane.b32.xlu0 %v316_v9, %s2238_s19 }
 0x2f7   :  { %219 = vrot.lane.b32.xlu0 %v212_v11, %s2239_s20  ;;  %v2500_v11 = vld [vmem:[%s2872_s3] sm:$0xff] }
 0x355   :  { %v214_v13 = vpop.permute.xlu1 %213 }
 0x356   :  { %v221_v14 = vsel %vm200_vm2, %v214_v13, %v2359_v25 }
 0x357   :  { %v233_v15 = vmul.f32 %v2421_v51, %v221_v14 }
 0x359   :  { %241 = vrot.lane.b32.xlu1 %v233_v15, %s2240_s1  ;;  %v322_v17 = vpop.permute.xlu1 %321 }
 0x35a   :  { %v333_v27 = vadd.f32 %v322_v17, %v269_v22 }
 0x35d   :  { %v216_v18 = vpop.permute.xlu0 %215  ;;  %v326_v19 = vpop.permute.xlu1 %325 }
 0x35e   :  { %v222_v20 = vsel %vm200_vm2, %v216_v18, %v2367_v29  ;;  %v335_v39 = vadd.f32 %v326_v19, %v271_v32 }
 0x35f   :  { %v234_v21 = vmul.f32 %v2423_v53, %v222_v20  ;;  %v2507_v20 = vld [vmem:[%s2872_s3 + $0x8] sm:$0xff]  ;;  %s2241_s3 = smov 96  }
 0x361   :  { %243 = vrot.lane.b32.xlu0 %v234_v21, %s2240_s1  ;;  %v324_v24 = vpop.permute.xlu0 %323  ;;  %v218_v31 = vpop.permute.xlu1 %217 }
 0x362   :  { %v334_v28 = vadd.f32 %v324_v24, %v270_v23  ;;  %v223_v37 = vsel %vm200_vm2, %v218_v31, %v2361_v26 }
 0x363   :  { %v235_v41 = vmul.f32 %v2421_v51, %v223_v37 }
 0x364   :  { %v339_v35 = vpack.c.bf16 %v334_v28, %v333_v27 }
 0x365   :  { %v328_v38 = vpop.permute.xlu0 %327 }
 0x366   :  { %v336_v40 = vadd.f32 %v328_v38, %v272_v36  ;;  %342 = vrot.lane.b32.xlu1 %v339_v35, %s2237_s16 }
 0x368   :  { %v340_v42 = vpack.c.bf16 %v336_v40, %v335_v39 }
 0x369   :  { %v220_v43 = vpop.permute.xlu0 %219 }
 0x36a   :  { %v224_v44 = vsel %vm200_vm2, %v220_v43, %v2369_v30  ;;  %393 = vrot.lane.b32.xlu0 %v340_v42, %s2237_s16  ;;  %245 = vrot.lane.b32.xlu1 %v235_v41, %s2240_s1 }
 0x36b   :  { %v236_v45 = vmul.f32 %v2423_v53, %v224_v44 }
 0x36e   :  { %247 = vrot.lane.b32.xlu0 %v236_v45, %s2240_s1 }
 0x3cb   :  { %v242_v46 = vpop.permute.xlu1 %241 }
 0x3cc   :  { %v253_v48 = vadd.f32 %v242_v46, %v196_v47 }
 0x3ce   :  { %v257_v56 = vmul.f32 0.25, %v253_v48 }
 0x3d3   :  { %v244_v54 = vpop.permute.xlu0 %243 }
 0x3d4   :  { %v254_v55 = vadd.f32 %v244_v54, %v197_v52 }
 0x3d6   :  { %v258_v57 = vmul.f32 0.25, %v254_v55 }
 0x3d8   :  { %v337_v58 = vpack.c.bf16 %v258_v57, %v257_v56  ;;  %v343_v59 = vpop.permute.xlu1 %342 }
 0x3d9   :  { %v349_v60 = vsel %vm344_vm3, %v343_v59, 0  ;;  %v2121_v59 = vld [vmem:[%s2876_s7] sm:$0xff]  }
 0x3da   :  { %1972 = vmatpush3.bf16.xpose.msra.mxu0 %v349_v60  ;;  %v2122_v60 = vld [vmem:[%s2876_s7 + $0x8] sm:$0xff]  }
 0x3db   :  { %1983 = vmatprep.subr.bf16.mxu0 %v2235_v8 }
 0x3dc   :  { %v394_v61 = vpop.permute.xlu0 %393  ;;  %v246_v62 = vpop.permute.xlu1 %245 }
 0x3dd   :  { %v399_v63 = vsel %vm344_vm3, %v394_v61, 0  ;;  %v255_v3 = vadd.f32 %v246_v62, %v198_v2 }
 0x3de   :  { %1978 = vmatpush3.bf16.xpose.msra.mxu1 %v399_v63 }
 0x3df   :  { %1989 = vmatprep.subr.bf16.mxu1 %v2235_v8  ;;  %v259_v7 = vmul.f32 0.25, %v255_v3 }
 0x3e0   :  { %v248_v5 = vpop.permute.xlu0 %247 }
 0x3e1   :  { %v256_v6 = vadd.f32 %v248_v5, %v199_v4  ;;  %1974 = vmatmul.mubr.msk.bf16.vlgmr.msra.gmra.mrb[4].mxu0 %vm344_vm3, %v337_v58 }
 0x3e2   :  { %1985 = vmatprep.mubr.msk.bf16.mxu0 %vm2236_vm1, %v2235_v8 }
 0x3e3   :  { %v260_v9 = vmul.f32 0.25, %v256_v6 }
 0x3e5   :  { %v338_v10 = vpack.c.bf16 %v260_v9, %v259_v7 }
 0x3e7   :  { %1980 = vmatmul.mubr.msk.bf16.vlgmr.msra.gmra.mrb[4].mxu1 %vm344_vm3, %v338_v10 }
 0x3e8   :  { %1991 = vmatprep.mubr.msk.bf16.mxu1 %vm2236_vm1, %v2235_v8 }
 0x4b4   :  { %v385_v13 = vpop.f32.mrb[4].mxu0 }
 0x4b5   :  { %v386_v14 = vadd.f32 %v385_v13, %v2500_v11  ;;  %v1975_v15 = vpop.f32.mrb[5].mxu0 }
 0x4b6   :  { %v388_v17 = vpop.f32.mrb[6].mxu0 }
 0x4b7   :  { %v1976_v18 = vpop.f32.mrb[7].mxu0  ;;  %v442_v19 = vsel %vm344_vm3, %v386_v14, -inf  ;;  %v389_v27 = vadd.f32 %v388_v17, %v2507_v20 }
 0x4b8   :  { %443 = vmax.xlane.f32.xlu1 %v442_v19 }
 0x4b9   :  { %v445_v36 = vsel %vm344_vm3, %v389_v27, -inf }
 0x4ba   :  { %v435_v21 = vpop.f32.mrb[4].mxu1 }
 0x4bb   :  { %v436_v22 = vadd.f32 %v435_v21, %v2500_v11  ;;  %v1981_v23 = vpop.f32.mrb[5].mxu1 }
 0x4bc   :  { %v438_v24 = vpop.f32.mrb[6].mxu1 }
 0x4bd   :  { %v439_v28 = vadd.f32 %v438_v24, %v2507_v20  ;;  %v1982_v31 = vpop.f32.mrb[7].mxu1  ;;  %v448_v32 = vsel %vm344_vm3, %v436_v22, -inf }
 0x4be   :  { %449 = vmax.xlane.f32.xlu0 %v448_v32 }
 0x4bf   :  { %v451_v35 = vsel %vm344_vm3, %v439_v28, -inf }
 0x4c0   :  { %452 = vmax.xlane.f32.xlu1 %v451_v35 }
 0x4c2   :  { %446 = vmax.xlane.f32.xlu0 %v445_v36 }
 0x4d1   :  { %535 = vrot.lane.b32.xlu1 %v485_v33, %s2241_s3 }
 0x4d8   :  { %487 = vrot.lane.b32.xlu0 %v484_v34, %s2241_s3 }
 0x545   :  { %v444_v37 = vpop.xlane.xlu1 %443 }
 0x546   :  { %v454_v38 = vsub.f32 %v386_v14, %v444_v37 }
 0x548   :  { %v458_v39 = vmul.f32 1.442695, %v454_v38 }
 0x54a   :  { %2147 = vpow2.f32 %v458_v39 }
 0x54b   :  { %v450_v40 = vpop.xlane.xlu0 %449 }
 0x54c   :  { %v456_v41 = vsub.f32 %v436_v22, %v450_v40 }
 0x54d   :  { %v453_v42 = vpop.xlane.xlu1 %452 }
 0x54e   :  { %v462_v43 = vmul.f32 1.442695, %v456_v41  ;;  %v457_v44 = vsub.f32 %v439_v28, %v453_v42 }
 0x54f   :  { %v447_v45 = vpop.xlane.xlu0 %446 }
 0x550   :  { %v464_v46 = vmul.f32 1.442695, %v457_v44  ;;  %v455_v47 = vsub.f32 %v389_v27, %v447_v45  ;;  %2149 = vpow2.f32 %v462_v43 }
 0x551   :  { %v536_v26 = vpop.permute.xlu1 %535 }
 0x552   :  { %2151 = vpow2.f32 %v464_v46  ;;  %v460_v30 = vmul.f32 1.442695, %v455_v47  ;;  %1990 = vmatpush3.bf16.msra.mxu1 %v536_v26 }
 0x553   :  { %v488_v33 = vpop.permute.xlu0 %487  ;;  %2001 = vmatprep.subr.bf16.mxu1 %v2235_v8 }
 0x554   :  { %v2148_v25 = vpop.eup %2147  ;;  %2153 = vpow2.f32 %v460_v30  ;;  %1984 = vmatpush3.bf16.msra.mxu0 %v488_v33 }
 0x555   :  { %v466_v29 = vsel %vm344_vm3, %v2148_v25, 0.0  ;;  %1995 = vmatprep.subr.bf16.mxu0 %v2235_v8 }
 0x556   :  { %467 = vadd.xlane.f32.xlu1 %v466_v29 }
 0x55a   :  { %v2150_v34 = vpop.eup %2149 }
 0x55b   :  { %v472_v58 = vsel %vm344_vm3, %v2150_v34, 0.0 }
 0x55c   :  { %v2152_v48 = vpop.eup %2151 }
 0x55d   :  { %v475_v52 = vsel %vm344_vm3, %v2152_v48, 0.0  ;;  %v483_v54 = vpack.c.bf16 %v2152_v48, %v2150_v34 }
 0x55e   :  { %v2154_v55 = vpop.eup %2153  ;;  %476 = vadd.xlane.f32.xlu1 %v475_v52 }
 0x55f   :  { %1992 = vmatmul.mubr.msk.bf16.vlgmr.msra.gmra.mrb[8].mxu1 %vm344_vm3, %v483_v54  ;;  %v469_v56 = vsel %vm344_vm3, %v2154_v55, 0.0  ;;  %v482_v57 = vpack.c.bf16 %v2154_v55, %v2148_v25 }
 0x560   :  { %470 = vadd.xlane.f32.xlu0 %v469_v56  ;;  %2003 = vmatprep.mubr.msk.bf16.mxu1 %vm2236_vm1, %v2235_v8 }
 0x561   :  { %1986 = vmatmul.mubr.msk.bf16.vlgmr.msra.gmra.mrb[8].mxu0 %vm344_vm3, %v482_v57  ;;  %2002 = vmatpush3.bf16.msra.mxu1 %v2122_v60 }
 0x562   :  { %1997 = vmatprep.mubr.msk.bf16.mxu0 %vm2236_vm1, %v2235_v8  ;;  %1996 = vmatpush3.bf16.msra.mxu0 %v2121_v59  ;;  %v1833_v59 = vld [vmem:[%s2874_s5] ss:$0 sm:$0xff] }
 0x563   :  { %2007 = vmatprep.subr.bf16.mxu0 %v2235_v8  ;;  %2015 = vmatprep.subr.bf16.mxu1 %v2235_v8 }
 0x564   :  { %473 = vadd.xlane.f32.xlu0 %v472_v58 }
 0x5e3   :  { %v468_v62 = vpop.xlane.xlu1 %467 }
 0x5eb   :  { %v477_v63 = vpop.xlane.xlu1 %476 }
 0x5ec   :  { %2155 = vrcp.f32 %v477_v63 }
 0x5ed   :  { %v471_v61 = vpop.xlane.xlu0 %470 }
 0x5f1   :  { %v474_v2 = vpop.xlane.xlu0 %473 }
 0x5f2   :  { %2157 = vrcp.f32 %v474_v2  ;;  %v2125_v2 = vld [vmem:[%s2878_s9] sm:$0xff]  }
 0x5f3   :  { %2159 = vrcp.f32 %v468_v62 }
 0x5f4   :  { %2161 = vrcp.f32 %v471_v61 }
 0x5f6   :  { %v2156_v4 = vpop.eup %2155 }
 0x5fc   :  { %v2158_v6 = vpop.eup %2157 }
 0x5fd   :  { %v2160_v10 = vpop.eup %2159 }
 0x5fe   :  { %v2162_v18 = vpop.eup %2161 }
 0x632   :  { %v575_v3 = vpop.f32.mrb[8].mxu1 }
 0x633   :  { %v1993_v5 = vpop.f32.mrb[9].mxu1  ;;  %v584_v13 = vmul.f32 %v2158_v6, %v575_v3  ;;  %v2126_v3 = vld [vmem:[%s2878_s9 + $0x8] sm:$0xff]  }
 0x634   :  { %v527_v7 = vpop.f32.mrb[8].mxu0  ;;  %v578_v9 = vpop.f32.mrb[10].mxu1  ;;  %v2128_v5 = vld [vmem:[%s2878_s9 + $0x18] sm:$0xff]  }
 0x635   :  { %v585_v14 = vmul.f32 %v2156_v4, %v578_v9  ;;  %v1987_v15 = vpop.f32.mrb[9].mxu0  ;;  %v1994_v17 = vpop.f32.mrb[11].mxu1  ;;  %v582_v21 = vmul.f32 %v2160_v10, %v527_v7  ;;  %v2127_v4 = vld [vmem:[%s2878_s9 + $0x10] sm:$0xff]  }
 0x636   :  { %v530_v19 = vpop.f32.mrb[10].mxu0 }
 0x637   :  { %v587_v22 = vpack.c.bf16 %v585_v14, %v584_v13  ;;  %v583_v23 = vmul.f32 %v2162_v18, %v530_v19  ;;  %v1988_v24 = vpop.f32.mrb[11].mxu0 }
 0x639   :  { %v586_v27 = vpack.c.bf16 %v583_v23, %v582_v21  ;;  %2004 = vmatmul.mubr.msk.bf16.vlgmr.msra.gmra.mrb[12].mxu1 %vm344_vm3, %v587_v22 }
 0x63a   :  { %2023 = vmatprep.mubr.msk.bf16.mxu1 %vm2236_vm1, %v2235_v8  ;;  %2016 = vmatpush3.bf16.msra.mxu1 %v2125_v2 }
 0x63b   :  { %1998 = vmatmul.mubr.msk.bf16.vlgmr.msra.gmra.mrb[12].mxu0 %vm344_vm3, %v586_v27  ;;  %2017 = vmatprep.subr.bf16.mxu1 %v2235_v8 }
 0x63c   :  { %2011 = vmatprep.mubr.msk.bf16.mxu0 %vm2236_vm1, %v2235_v8 }
 0x63e   :  { %2018 = vmatpush3.bf16.msra.mxu1 %v2126_v3 }
 0x63f   :  { %2019 = vmatprep.subr.bf16.mxu1 %v2235_v8 }
 0x642   :  { %2020 = vmatpush3.bf16.msra.mxu1 %v2127_v4 }
 0x643   :  { %2021 = vmatprep.subr.bf16.mxu1 %v2235_v8 }
 0x646   :  { %2022 = vmatpush3.bf16.msra.mxu1 %v2128_v5 }
 0x647   :  { %2043 = vmatprep.subr.bf16.mxu1 %v2235_v8 }
 0x70c   :  { %v685_v28 = vpop.f32.mrb[12].mxu1 }
 0x70d   :  { %v2005_v31 = vpop.f32.mrb[13].mxu1  ;;  %v693_v36 = vsel %vm54_vm0, %v685_v28, 0.0 }
 0x70e   :  { %v635_v32 = vpop.f32.mrb[12].mxu0  ;;  %v688_v35 = vpop.f32.mrb[14].mxu1 }
 0x70f   :  { %v692_v37 = vsel %vm54_vm0, %v635_v32, 0.0  ;;  %v1999_v38 = vpop.f32.mrb[13].mxu0  ;;  %v2006_v39 = vpop.f32.mrb[15].mxu1  ;;  %v696_v42 = vsel %vm54_vm0, %v688_v35, 0.0 }
 0x710   :  { %v694_v40 = vadd.f32 %v693_v36, %v692_v37  ;;  %v638_v41 = vpop.f32.mrb[14].mxu0 }
 0x711   :  { %v695_v43 = vsel %vm54_vm0, %v638_v41, 0.0  ;;  %v2000_v44 = vpop.f32.mrb[15].mxu0 }
 0x712   :  { %v2554_v45 = vadd.f32 %v694_v40, %v2313_v0  ;;  %v697_v46 = vadd.f32 %v696_v42, %v695_v43  ;;  %v2123_v0 = vld [vmem:[%s2877_s8] sm:$0xff]  }
 0x713   :  { %2008 = vmatpush3.bf16.msra.mxu0 %v2123_v0 }
 0x714   :  { %v2557_v47 = vadd.f32 %v697_v46, %v2318_v1  ;;  %v701_v26 = vmul.f32 %v2554_v45, %v2554_v45  ;;  %2009 = vmatprep.subr.bf16.mxu0 %v2235_v8  ;;  %v2124_v1 = vld [vmem:[%s2877_s8 + $0x8] sm:$0xff]  }
 0x716   :  { %v703_v30 = vsel %vm54_vm0, %v701_v26, 0.0  ;;  %v702_v33 = vmul.f32 %v2557_v47, %v2557_v47 }
 0x717   :  { %704 = vadd.xlane.f32.xlu0 %v703_v30  ;;  %2010 = vmatpush3.bf16.msra.mxu0 %v2124_v1 }
 0x718   :  { %v706_v25 = vsel %vm54_vm0, %v702_v33, 0.0  ;;  %2027 = vmatprep.subr.bf16.mxu0 %v2235_v8 }
 0x719   :  { %707 = vadd.xlane.f32.xlu1 %v706_v25 }
 0x7a4   :  { %v705_v29 = vpop.xlane.xlu0 %704 }
 0x7a5   :  { %v709_v34 = vmul.f32 0.03125, %v705_v29 }
 0x7a6   :  { %v708_v48 = vpop.xlane.xlu1 %707 }
 0x7a7   :  { %v711_v52 = vadd.f32 1e-06, %v709_v34  ;;  %v710_v54 = vmul.f32 0.03125, %v708_v48 }
 0x7a9   :  { %2163 = vrsqrt.f32 %v711_v52  ;;  %v712_v55 = vadd.f32 1e-06, %v710_v54  ;;  %v1845_v52 = vld [vmem:[%s2873_s4 + $0x1] ss:$0 sm:$0xff] }
 0x7ab   :  { %2165 = vrsqrt.f32 %v712_v55 }
 0x7b3   :  { %v2164_v56 = vpop.eup %2163 }
 0x7b4   :  { %v715_v57 = vmul.f32 %v2164_v56, %v2554_v45 }
 0x7b5   :  { %v2166_v58 = vpop.eup %2165 }
 0x7b6   :  { %v716_v60 = vmul.f32 %v2166_v58, %v2557_v47  ;;  %v723_v61 = vmul.f32 %v1833_v59, %v715_v57  ;;  %v2131_v57 = vld [vmem:[%s2875_s6 + $0x30] sm:$0xff]  }
 0x7b8   :  { %v724_v62 = vmul.f32 %v1833_v59, %v716_v60  ;;  %v2132_v59 = vld [vmem:[%s2875_s6 + $0x38] sm:$0xff]  }
 0x7ba   :  { %v725_v63 = vpack.c.bf16 %v724_v62, %v723_v61 }
 0x7bc   :  { %2012 = vmatmul.mubr.msk.bf16.vlgmr.msra.gmra.mrb[16].mxu0 %vm54_vm0, %v725_v63 }
 0x7bd   :  { %2031 = vmatprep.mubr.msk.bf16.mxu0 %vm2236_vm1, %v2235_v8 }
 0x88f   :  { %v779_v6 = vpop.f32.mrb[16].mxu0 }
 0x890   :  { %802 = vrot.lane.b32.xlu0 %v779_v6, %s2242_s30  ;;  %v2013_v7 = vpop.f32.mrb[17].mxu0  ;;  %v1837_v13 = vmul.f32 -1.442695, %v779_v6 }
 0x891   :  { %v782_v9 = vpop.f32.mrb[18].mxu0 }
 0x892   :  { %804 = vrot.lane.b32.xlu1 %v782_v9, %s2242_s30  ;;  %v2014_v10 = vpop.f32.mrb[19].mxu0  ;;  %v1838_v14 = vmul.f32 -1.442695, %v782_v9  ;;  %2167 = vpow2.f32 %v1837_v13 }
 0x894   :  { %2169 = vpow2.f32 %v1838_v14 }
 0x89c   :  { %v2168_v15 = vpop.eup %2167 }
 0x89d   :  { %v792_v18 = vadd.f32 1.0, %v2168_v15 }
 0x89e   :  { %v2170_v17 = vpop.eup %2169 }
 0x89f   :  { %v793_v19 = vadd.f32 1.0, %v2170_v17  ;;  %2171 = vrcp.f32 %v792_v18 }
 0x8a1   :  { %2173 = vrcp.f32 %v793_v19 }
 0x8a9   :  { %v2172_v21 = vpop.eup %2171 }
 0x8aa   :  { %v798_v24 = vmul.f32 %v2172_v21, %v779_v6 }
 0x8ab   :  { %v2174_v22 = vpop.eup %2173 }
 0x8ac   :  { %v799_v27 = vmul.f32 %v2174_v22, %v782_v9 }
 0x902   :  { %v803_v23 = vpop.permute.xlu0 %802 }
 0x903   :  { %v808_v31 = vmul.f32 %v803_v23, %v798_v24 }
 0x904   :  { %v805_v28 = vpop.permute.xlu1 %804 }
 0x905   :  { %v809_v32 = vmul.f32 %v805_v28, %v799_v27 }
 0x907   :  { %v810_v35 = vpack.c.bf16 %v809_v32, %v808_v31 }
 0x909   :  { %2024 = vmatmul.mubr.msk.bf16.vlgmr.msra.gmra.mrb[16].mxu1 %vm843_vm4, %v810_v35 }
 0x90a   :  { %2045 = vmatprep.mubr.msk.bf16.mxu1 %vm2236_vm1, %v2235_v8 }
 0x9dc   :  { %v881_v36 = vpop.f32.mrb[16].mxu1 }
 0x9dd   :  { %v2603_v37 = vadd.f32 %v881_v36, %v2554_v45  ;;  %v2025_v38 = vpop.f32.mrb[17].mxu1  ;;  %v2129_v45 = vld [vmem:[%s2875_s6 + $0x20] sm:$0xff]  }
 0x9de   :  { %v884_v39 = vpop.f32.mrb[18].mxu1  ;;  %2028 = vmatpush3.bf16.msra.mxu0 %v2129_v45 }
 0x9df   :  { %v2606_v40 = vadd.f32 %v884_v39, %v2557_v47  ;;  %v2026_v41 = vpop.f32.mrb[19].mxu1  ;;  %v892_v42 = vmul.f32 %v2603_v37, %v2603_v37  ;;  %2029 = vmatprep.subr.bf16.mxu0 %v2235_v8  ;;  %v2130_v47 = vld [vmem:[%s2875_s6 + $0x28] sm:$0xff]  }
 0x9e1   :  { %v894_v43 = vsel %vm54_vm0, %v892_v42, 0.0  ;;  %v893_v44 = vmul.f32 %v2606_v40, %v2606_v40 }
 0x9e2   :  { %895 = vadd.xlane.f32.xlu1 %v894_v43  ;;  %2030 = vmatpush3.bf16.msra.mxu0 %v2130_v47 }
 0x9e3   :  { %v897_v46 = vsel %vm54_vm0, %v893_v44, 0.0  ;;  %2035 = vmatprep.subr.bf16.mxu0 %v2235_v8 }
 0x9e4   :  { %898 = vadd.xlane.f32.xlu0 %v897_v46 }
 0xa6f   :  { %v896_v26 = vpop.xlane.xlu1 %895 }
 0xa70   :  { %v900_v30 = vmul.f32 0.03125, %v896_v26 }
 0xa71   :  { %v899_v33 = vpop.xlane.xlu0 %898 }
 0xa72   :  { %v902_v25 = vadd.f32 1e-06, %v900_v30  ;;  %v901_v0 = vmul.f32 0.03125, %v899_v33 }
 0xa74   :  { %2175 = vrsqrt.f32 %v902_v25  ;;  %v903_v1 = vadd.f32 1e-06, %v901_v0 }
 0xa76   :  { %2177 = vrsqrt.f32 %v903_v1 }
 0xa7e   :  { %v2176_v29 = vpop.eup %2175 }
 0xa7f   :  { %v906_v34 = vmul.f32 %v2176_v29, %v2603_v37 }
 0xa80   :  { %v2178_v48 = vpop.eup %2177 }
 0xa81   :  { %v907_v54 = vmul.f32 %v2178_v48, %v2606_v40  ;;  %v914_v55 = vmul.f32 %v1845_v52, %v906_v34 }
 0xa83   :  { %v915_v56 = vmul.f32 %v1845_v52, %v907_v54 }
 0xa85   :  { %v916_v58 = vpack.c.bf16 %v915_v56, %v914_v55 }
 0xa87   :  { %2032 = vmatmul.mubr.msk.bf16.vlgmr.msra.gmra.mrb[20].mxu0 %vm54_vm0, %v916_v58 }
 0xa88   :  { %2036 = vmatpush3.bf16.msra.mxu0 %v2131_v57  ;;  %2039 = vmatprep.mubr.msk.bf16.mxu0 %vm2236_vm1, %v2235_v8 }
 0xa89   :  { %2037 = vmatprep.subr.bf16.mxu0 %v2235_v8 }
 0xa8c   :  { %2038 = vmatpush3.bf16.msra.mxu0 %v2132_v59 }
 0xa8d   :  { %2049 = vmatprep.subr.bf16.mxu0 %v2235_v8 }
 0xa8f   :  { %2040 = vmatmul.mubr.msk.bf16.vlgmr.msra.gmra.mrb[24].mxu0 %vm54_vm0, %v916_v58 }
 0xa90   :  { %2051 = vmatprep.mubr.msk.bf16.mxu0 %vm2236_vm1, %v2235_v8 }
 0xb5a   :  { %v2641_v60 = vpop.f32.mrb[20].mxu0 }
 0xb5b   :  { %1099 = vrot.lane.b32.xlu0 %v2641_v60, %s2237_s16  ;;  %v2033_v61 = vpop.f32.mrb[21].mxu0  ;;  %v1091_v56 = vmul.f32 %v2641_v60, %v2449_v12 }
 0xb5c   :  { %v2645_v62 = vpop.f32.mrb[22].mxu0 }
 0xb5d   :  { %1101 = vrot.lane.b32.xlu1 %v2645_v62, %s2237_s16  ;;  %v2034_v63 = vpop.f32.mrb[23].mxu0  ;;  %v1305_v2 = vpack.c.bf16 %v2645_v62, %v2641_v60  ;;  %v1092_v57 = vmul.f32 %v2645_v62, %v2454_v16 }
 0xb62   :  { %v2651_v3 = vpop.f32.mrb[24].mxu0 }
 0xb63   :  { %1103 = vrot.lane.b32.xlu1 %v2651_v3, %s2237_s16  ;;  %v2041_v4 = vpop.f32.mrb[25].mxu0 }
 0xb64   :  { %v2655_v5 = vpop.f32.mrb[26].mxu0 }
 0xb65   :  { %1105 = vrot.lane.b32.xlu0 %v2655_v5, %s2237_s16  ;;  %v2042_v6 = vpop.f32.mrb[27].mxu0  ;;  %v1306_v7 = vpack.c.bf16 %v2655_v5, %v2651_v3 }
 0xb66   :  { %v1093_v6 = vmul.f32 %v2651_v3, %v2449_v12 }
 0xbcd   :  { %v1100_v9 = vpop.permute.xlu0 %1099 }
 0xbce   :  { %1111 = vrot.lane.b32.xlu1 %v1100_v9, %s2239_s20 }
 0xbcf   :  { %v1102_v10 = vpop.permute.xlu1 %1101 }
 0xbd0   :  { %1114 = vrot.lane.b32.xlu0 %v1102_v10, %s2239_s20 }
 0xbd5   :  { %v1104_v13 = vpop.permute.xlu1 %1103 }
 0xbd6   :  { %1117 = vrot.lane.b32.xlu1 %v1104_v13, %s2239_s20 }
 0xbd7   :  { %v1106_v14 = vpop.permute.xlu0 %1105 }
 0xbd8   :  { %1120 = vrot.lane.b32.xlu0 %v1106_v14, %s2239_s20 }
 0xc40   :  { %v1112_v15 = vpop.permute.xlu1 %1111 }
 0xc41   :  { %v1113_v17 = vsel %vm200_vm2, %v1112_v15, %v1100_v9 }
 0xc42   :  { %1123 = vrot.lane.b32.xlu1 %v1113_v17, %s2239_s20  ;;  %v1115_v18 = vpop.permute.xlu0 %1114 }
 0xc43   :  { %v1116_v19 = vsel %vm200_vm2, %v1115_v18, %v1102_v10 }
 0xc44   :  { %1125 = vrot.lane.b32.xlu0 %v1116_v19, %s2239_s20 }
 0xc48   :  { %v1118_v21 = vpop.permute.xlu1 %1117 }
 0xc49   :  { %v1119_v22 = vsel %vm200_vm2, %v1118_v21, %v1104_v13 }
 0xc4a   :  { %1127 = vrot.lane.b32.xlu1 %v1119_v22, %s2239_s20  ;;  %v1121_v23 = vpop.permute.xlu0 %1120 }
 0xc4b   :  { %v1122_v24 = vsel %vm200_vm2, %v1121_v23, %v1106_v14 }
 0xc4c   :  { %1129 = vrot.lane.b32.xlu0 %v1122_v24, %s2239_s20 }
 0xc4e   :  { %1039 = vrot.lane.b32.xlu1 %v2641_v60, %s2239_s20 }
 0xc50   :  { %1042 = vrot.lane.b32.xlu0 %v2645_v62, %s2239_s20 }
 0xc52   :  { %1045 = vrot.lane.b32.xlu1 %v2651_v3, %s2239_s20 }
 0xc54   :  { %1048 = vrot.lane.b32.xlu0 %v2655_v5, %s2239_s20 }
 0xcb4   :  { %v1124_v27 = vpop.permute.xlu1 %1123 }
 0xcb5   :  { %v1131_v36 = vsel %vm200_vm2, %v1124_v27, %v1100_v9  ;;  %v1094_v9 = vmul.f32 %v2655_v5, %v2454_v16  ;;  %v1035_v16 = vmul.f32 %v2641_v60, %v2406_v49 }
 0xcb6   :  { %v1126_v28 = vpop.permute.xlu0 %1125  ;;  %v1135_v43 = vmul.f32 %v1131_v36, %v2421_v51 }
 0xcb7   :  { %v1132_v41 = vsel %vm200_vm2, %v1126_v28, %v1102_v10 }
 0xcb8   :  { %v1136_v46 = vmul.f32 %v1132_v41, %v2423_v53  ;;  %v1037_v41 = vmul.f32 %v2651_v3, %v2406_v49 }
 0xcbc   :  { %v1128_v31 = vpop.permute.xlu1 %1127 }
 0xcbd   :  { %v1133_v44 = vsel %vm200_vm2, %v1128_v31, %v1104_v13 }
 0xcbe   :  { %v1130_v32 = vpop.permute.xlu0 %1129  ;;  %v1137_v47 = vmul.f32 %v1133_v44, %v2421_v51  ;;  %v1038_v44 = vmul.f32 %v2655_v5, %v2417_v50 }
 0xcbf   :  { %v1134_v45 = vsel %vm200_vm2, %v1130_v32, %v1106_v14 }
 0xcc0   :  { %v1040_v35 = vpop.permute.xlu1 %1039  ;;  %v1138_v26 = vmul.f32 %v1134_v45, %v2423_v53 }
 0xcc1   :  { %v1041_v38 = vsel %vm200_vm2, %v1040_v35, %v2641_v60 }
 0xcc2   :  { %1051 = vrot.lane.b32.xlu1 %v1041_v38, %s2239_s20  ;;  %v1043_v39 = vpop.permute.xlu0 %1042 }
 0xcc3   :  { %v1044_v42 = vsel %vm200_vm2, %v1043_v39, %v2645_v62 }
 0xcc4   :  { %1053 = vrot.lane.b32.xlu0 %v1044_v42, %s2239_s20  ;;  %v1046_v30 = vpop.permute.xlu1 %1045 }
 0xcc5   :  { %v1047_v25 = vsel %vm200_vm2, %v1046_v30, %v2651_v3 }
 0xcc6   :  { %1143 = vrot.lane.b32.xlu1 %v1135_v43, %s2238_s19  ;;  %v1049_v33 = vpop.permute.xlu0 %1048 }
 0xcc7   :  { %v1050_v0 = vsel %vm200_vm2, %v1049_v33, %v2655_v5 }
 0xcc8   :  { %1145 = vrot.lane.b32.xlu0 %v1136_v46, %s2238_s19 }
 0xcca   :  { %1147 = vrot.lane.b32.xlu1 %v1137_v47, %s2238_s19 }
 0xccc   :  { %1149 = vrot.lane.b32.xlu0 %v1138_v26, %s2238_s19 }
 0xcce   :  { %1055 = vrot.lane.b32.xlu1 %v1047_v25, %s2239_s20 }
 0xcd0   :  { %1057 = vrot.lane.b32.xlu0 %v1050_v0, %s2239_s20 }
 0xd34   :  { %v1052_v1 = vpop.permute.xlu1 %1051 }
 0xd35   :  { %v1059_v29 = vsel %vm200_vm2, %v1052_v1, %v2641_v60 }
 0xd36   :  { %v1063_v34 = vmul.f32 %v1059_v29, %v2421_v51  ;;  %v1054_v48 = vpop.permute.xlu0 %1053 }
 0xd37   :  { %v1060_v52 = vsel %vm200_vm2, %v1054_v48, %v2645_v62 }
 0xd38   :  { %v1064_v54 = vmul.f32 %v1060_v52, %v2423_v53  ;;  %1071 = vrot.lane.b32.xlu1 %v1063_v34, %s2240_s1  ;;  %v1144_v55 = vpop.permute.xlu1 %1143 }
 0xd39   :  { %v1155_v59 = vadd.f32 %v1144_v55, %v1091_v56 }
 0xd3a   :  { %1073 = vrot.lane.b32.xlu0 %v1064_v54, %s2240_s1  ;;  %v1146_v58 = vpop.permute.xlu0 %1145 }
 0xd3b   :  { %v1156_v61 = vadd.f32 %v1146_v58, %v1092_v57 }
 0xd3c   :  { %v1148_v63 = vpop.permute.xlu1 %1147 }
 0xd3d   :  { %v1161_v4 = vpack.c.bf16 %v1156_v61, %v1155_v59  ;;  %v1157_v13 = vadd.f32 %v1148_v63, %v1093_v6 }
 0xd3e   :  { %v1150_v10 = vpop.permute.xlu0 %1149 }
 0xd3f   :  { %v1158_v14 = vadd.f32 %v1150_v10, %v1094_v9  ;;  %1164 = vrot.lane.b32.xlu1 %v1161_v4, %s2237_s16 }
 0xd40   :  { %v1056_v15 = vpop.permute.xlu1 %1055 }
 0xd41   :  { %v1162_v17 = vpack.c.bf16 %v1158_v14, %v1157_v13  ;;  %v1061_v18 = vsel %vm200_vm2, %v1056_v15, %v2651_v3 }
 0xd42   :  { %v1065_v19 = vmul.f32 %v1061_v18, %v2421_v51  ;;  %v1058_v21 = vpop.permute.xlu0 %1057  ;;  %v1036_v51 = vmul.f32 %v2645_v62, %v2417_v50 }
 0xd43   :  { %v1062_v22 = vsel %vm200_vm2, %v1058_v21, %v2655_v5  ;;  %1214 = vrot.lane.b32.xlu0 %v1162_v17, %s2237_s16 }
 0xd44   :  { %v1066_v12 = vmul.f32 %v1062_v22, %v2423_v53  ;;  %1075 = vrot.lane.b32.xlu1 %v1065_v19, %s2240_s1 }
 0xd47   :  { %1077 = vrot.lane.b32.xlu0 %v1066_v12, %s2240_s1 }
 0xdaa   :  { %v1072_v23 = vpop.permute.xlu1 %1071 }
 0xdab   :  { %v1083_v24 = vadd.f32 %v1072_v23, %v1035_v16  ;;  %v2133_v23 = vld [vmem:[%s2876_s7 + $0x10] sm:$0xff]  }
 0xdac   :  { %v1074_v27 = vpop.permute.xlu0 %1073 }
 0xdad   :  { %v1084_v28 = vadd.f32 %v1074_v27, %v1036_v51  ;;  %v1087_v31 = vmul.f32 0.25, %v1083_v24  ;;  %v2134_v24 = vld [vmem:[%s2876_s7 + $0x18] sm:$0xff]  }
 0xdaf   :  { %v1088_v32 = vmul.f32 0.25, %v1084_v28 }
 0xdb1   :  { %v1159_v35 = vpack.c.bf16 %v1088_v32, %v1087_v31  ;;  %v1165_v36 = vpop.permute.xlu1 %1164 }
 0xdb2   :  { %v1170_v53 = vsel %vm344_vm3, %v1165_v36, 0 }
 0xdb3   :  { %2044 = vmatpush3.bf16.xpose.msra.mxu1 %v1170_v53 }
 0xdb4   :  { %2055 = vmatprep.subr.bf16.mxu1 %v2235_v8 }
 0xdb5   :  { %v1215_v38 = vpop.permute.xlu0 %1214 }
 0xdb6   :  { %v1220_v39 = vsel %vm344_vm3, %v1215_v38, 0  ;;  %v1076_v42 = vpop.permute.xlu1 %1075 }
 0xdb7   :  { %2050 = vmatpush3.bf16.xpose.msra.mxu0 %v1220_v39  ;;  %v1085_v43 = vadd.f32 %v1076_v42, %v1037_v41 }
 0xdb8   :  { %2061 = vmatprep.subr.bf16.mxu0 %v2235_v8 }
 0xdb9   :  { %v1078_v46 = vpop.permute.xlu0 %1077  ;;  %v1089_v47 = vmul.f32 0.25, %v1085_v43 }
 0xdba   :  { %v1086_v45 = vadd.f32 %v1078_v46, %v1038_v44  ;;  %2046 = vmatmul.mubr.msk.bf16.vlgmr.msra.gmra.mrb[20].mxu1 %vm344_vm3, %v1159_v35 }
 0xdbb   :  { %2057 = vmatprep.mubr.msk.bf16.mxu1 %vm2236_vm1, %v2235_v8 }
 0xdbc   :  { %v1090_v26 = vmul.f32 0.25, %v1086_v45 }
 0xdbe   :  { %v1160_v30 = vpack.c.bf16 %v1090_v26, %v1089_v47 }
 0xdc0   :  { %2052 = vmatmul.mubr.msk.bf16.vlgmr.msra.gmra.mrb[28].mxu0 %vm344_vm3, %v1160_v30 }
 0xdc1   :  { %2063 = vmatprep.mubr.msk.bf16.mxu0 %vm2236_vm1, %v2235_v8 }
 0xe8d   :  { %v1206_v49 = vpop.f32.mrb[20].mxu1 }
 0xe8e   :  { %v1207_v50 = vadd.f32 %v1206_v49, %v2500_v11  ;;  %v2047_v33 = vpop.f32.mrb[21].mxu1 }
 0xe8f   :  { %v1209_v25 = vpop.f32.mrb[22].mxu1 }
 0xe90   :  { %v1210_v0 = vadd.f32 %v1209_v25, %v2507_v20  ;;  %v2048_v1 = vpop.f32.mrb[23].mxu1  ;;  %v1263_v29 = vsel %vm344_vm3, %v1207_v50, -inf }
 0xe91   :  { %1264 = vmax.xlane.f32.xlu1 %v1263_v29 }
 0xe92   :  { %v1266_v34 = vsel %vm344_vm3, %v1210_v0, -inf }
 0xe93   :  { %1267 = vmax.xlane.f32.xlu0 %v1266_v34  ;;  %v1256_v48 = vpop.f32.mrb[28].mxu0 }
 0xe94   :  { %v1257_v52 = vadd.f32 %v1256_v48, %v2500_v11  ;;  %v2053_v54 = vpop.f32.mrb[29].mxu0 }
 0xe95   :  { %v1259_v55 = vpop.f32.mrb[30].mxu0 }
 0xe96   :  { %v1260_v56 = vadd.f32 %v1259_v55, %v2507_v20  ;;  %v2054_v57 = vpop.f32.mrb[31].mxu0  ;;  %v1269_v58 = vsel %vm344_vm3, %v1257_v52, -inf }
 0xe97   :  { %1270 = vmax.xlane.f32.xlu0 %v1269_v58 }
 0xe98   :  { %v1272_v59 = vsel %vm344_vm3, %v1260_v56, -inf }
 0xe99   :  { %1273 = vmax.xlane.f32.xlu1 %v1272_v59 }
 0xeaa   :  { %1356 = vrot.lane.b32.xlu1 %v1306_v7, %s2241_s3 }
 0xead   :  { %1308 = vrot.lane.b32.xlu0 %v1305_v2, %s2241_s3 }
 0xf1e   :  { %v1265_v11 = vpop.xlane.xlu1 %1264 }
 0xf1f   :  { %v1275_v61 = vsub.f32 %v1207_v50, %v1265_v11 }
 0xf20   :  { %v1268_v20 = vpop.xlane.xlu0 %1267 }
 0xf21   :  { %v1279_v63 = vmul.f32 1.442695, %v1275_v61  ;;  %v1276_v4 = vsub.f32 %v1210_v0, %v1268_v20 }
 0xf23   :  { %2179 = vpow2.f32 %v1279_v63  ;;  %v1281_v6 = vmul.f32 1.442695, %v1276_v4 }
 0xf24   :  { %v1271_v9 = vpop.xlane.xlu0 %1270 }
 0xf25   :  { %2181 = vpow2.f32 %v1281_v6  ;;  %v1277_v10 = vsub.f32 %v1257_v52, %v1271_v9 }
 0xf26   :  { %v1274_v13 = vpop.xlane.xlu1 %1273 }
 0xf27   :  { %v1283_v14 = vmul.f32 1.442695, %v1277_v10  ;;  %v1278_v15 = vsub.f32 %v1260_v56, %v1274_v13 }
 0xf28   :  { %v1309_v3 = vpop.permute.xlu0 %1308 }
 0xf29   :  { %2183 = vpow2.f32 %v1283_v14  ;;  %v1285_v5 = vmul.f32 1.442695, %v1278_v15  ;;  %2056 = vmatpush3.bf16.msra.mxu1 %v1309_v3 }
 0xf2a   :  { %v1357_v7 = vpop.permute.xlu1 %1356  ;;  %2067 = vmatprep.subr.bf16.mxu1 %v2235_v8 }
 0xf2b   :  { %2185 = vpow2.f32 %v1285_v5  ;;  %2062 = vmatpush3.bf16.msra.mxu0 %v1357_v7 }
 0xf2c   :  { %2073 = vmatprep.subr.bf16.mxu0 %v2235_v8 }
 0xf2d   :  { %v2180_v60 = vpop.eup %2179 }
 0xf2e   :  { %v1287_v62 = vsel %vm344_vm3, %v2180_v60, 0.0 }
 0xf2f   :  { %v2182_v2 = vpop.eup %2181  ;;  %1288 = vadd.xlane.f32.xlu1 %v1287_v62 }
 0xf30   :  { %v1290_v17 = vsel %vm344_vm3, %v2182_v2, 0.0  ;;  %v1303_v18 = vpack.c.bf16 %v2182_v2, %v2180_v60  ;;  %v1873_v2 = vld [vmem:[%s2874_s5 + $0x1] ss:$0 sm:$0xff] }
 0xf31   :  { %1291 = vadd.xlane.f32.xlu0 %v1290_v17 }
 0xf32   :  { %2058 = vmatmul.mubr.msk.bf16.vlgmr.msra.gmra.mrb[24].mxu1 %vm344_vm3, %v1303_v18 }
 0xf33   :  { %v2184_v19 = vpop.eup %2183  ;;  %2069 = vmatprep.mubr.msk.bf16.mxu1 %vm2236_vm1, %v2235_v8  ;;  %2068 = vmatpush3.bf16.msra.mxu1 %v2133_v23  ;;  %v2140_v23 = vld [vmem:[%s2878_s9 + $0x38] sm:$0xff]  }
 0xf34   :  { %v1293_v21 = vsel %vm344_vm3, %v2184_v19, 0.0  ;;  %2079 = vmatprep.subr.bf16.mxu1 %v2235_v8 }
 0xf35   :  { %v2186_v22 = vpop.eup %2185  ;;  %1294 = vadd.xlane.f32.xlu0 %v1293_v21 }
 0xf36   :  { %v1296_v12 = vsel %vm344_vm3, %v2186_v22, 0.0  ;;  %v1304_v16 = vpack.c.bf16 %v2186_v22, %v2184_v19  ;;  %v2137_v22 = vld [vmem:[%s2878_s9 + $0x20] sm:$0xff]  }
 0xf37   :  { %1297 = vadd.xlane.f32.xlu1 %v1296_v12  ;;  %v2138_v12 = vld [vmem:[%s2878_s9 + $0x28] sm:$0xff]  }
 0xf38   :  { %2064 = vmatmul.mubr.msk.bf16.vlgmr.msra.gmra.mrb[32].mxu0 %vm344_vm3, %v1304_v16  ;;  %v2139_v16 = vld [vmem:[%s2878_s9 + $0x30] sm:$0xff]  }
 0xf39   :  { %2075 = vmatprep.mubr.msk.bf16.mxu0 %vm2236_vm1, %v2235_v8  ;;  %2074 = vmatpush3.bf16.msra.mxu0 %v2134_v24 }
 0xf3a   :  { %2087 = vmatprep.subr.bf16.mxu0 %v2235_v8 }
 0xfbc   :  { %v1289_v51 = vpop.xlane.xlu1 %1288 }
 0xfbd   :  { %2187 = vrcp.f32 %v1289_v51 }
 0xfbe   :  { %v1292_v27 = vpop.xlane.xlu0 %1291 }
 0xfbf   :  { %2189 = vrcp.f32 %v1292_v27 }
 0xfc2   :  { %v1295_v28 = vpop.xlane.xlu0 %1294 }
 0xfc3   :  { %2191 = vrcp.f32 %v1295_v28 }
 0xfc4   :  { %v1298_v31 = vpop.xlane.xlu1 %1297 }
 0xfc5   :  { %2193 = vrcp.f32 %v1298_v31 }
 0xfc7   :  { %v2188_v35 = vpop.eup %2187 }
 0xfc9   :  { %v2190_v53 = vpop.eup %2189 }
 0xfcd   :  { %v2192_v46 = vpop.eup %2191 }
 0xfcf   :  { %v2194_v47 = vpop.eup %2193 }
0x1005   :  { %v1348_v32 = vpop.f32.mrb[24].mxu1 }
0x1006   :  { %v2059_v36 = vpop.f32.mrb[25].mxu1  ;;  %v1403_v39 = vmul.f32 %v2188_v35, %v1348_v32 }
0x1007   :  { %v1351_v38 = vpop.f32.mrb[26].mxu1 }
0x1008   :  { %v1404_v41 = vmul.f32 %v2190_v53, %v1351_v38  ;;  %v2060_v42 = vpop.f32.mrb[27].mxu1 }
0x100a   :  { %v1407_v43 = vpack.c.bf16 %v1404_v41, %v1403_v39 }
0x100b   :  { %v1396_v44 = vpop.f32.mrb[32].mxu0 }
0x100c   :  { %v2065_v45 = vpop.f32.mrb[33].mxu0  ;;  %2070 = vmatmul.mubr.msk.bf16.vlgmr.msra.gmra.mrb[28].mxu1 %vm344_vm3, %v1407_v43  ;;  %v1405_v30 = vmul.f32 %v2192_v46, %v1396_v44 }
0x100d   :  { %v1399_v26 = vpop.f32.mrb[34].mxu0  ;;  %2083 = vmatprep.mubr.msk.bf16.mxu1 %vm2236_vm1, %v2235_v8 }
0x100e   :  { %v1406_v49 = vmul.f32 %v2194_v47, %v1399_v26  ;;  %v2066_v50 = vpop.f32.mrb[35].mxu0 }
0x1010   :  { %v1408_v33 = vpack.c.bf16 %v1406_v49, %v1405_v30 }
0x1012   :  { %2076 = vmatmul.mubr.msk.bf16.vlgmr.msra.gmra.mrb[36].mxu0 %vm344_vm3, %v1408_v33 }
0x1013   :  { %2095 = vmatprep.mubr.msk.bf16.mxu0 %vm2236_vm1, %v2235_v8  ;;  %2088 = vmatpush3.bf16.msra.mxu0 %v2137_v22 }
0x1014   :  { %2089 = vmatprep.subr.bf16.mxu0 %v2235_v8 }
0x1017   :  { %2090 = vmatpush3.bf16.msra.mxu0 %v2138_v12 }
0x1018   :  { %2091 = vmatprep.subr.bf16.mxu0 %v2235_v8 }
0x101b   :  { %2092 = vmatpush3.bf16.msra.mxu0 %v2139_v16 }
0x101c   :  { %2093 = vmatprep.subr.bf16.mxu0 %v2235_v8 }
0x101f   :  { %2094 = vmatpush3.bf16.msra.mxu0 %v2140_v23 }
0x10df   :  { %v1457_v25 = vpop.f32.mrb[28].mxu1 }
0x10e0   :  { %v2071_v0 = vpop.f32.mrb[29].mxu1  ;;  %v1514_v48 = vsel %vm54_vm0, %v1457_v25, 0.0 }
0x10e1   :  { %v1460_v1 = vpop.f32.mrb[30].mxu1 }
0x10e2   :  { %v2072_v29 = vpop.f32.mrb[31].mxu1  ;;  %v1517_v57 = vsel %vm54_vm0, %v1460_v1, 0.0 }
0x10e5   :  { %v1507_v34 = vpop.f32.mrb[36].mxu0 }
0x10e6   :  { %v1515_v52 = vsel %vm54_vm0, %v1507_v34, 0.0  ;;  %v2077_v54 = vpop.f32.mrb[37].mxu0 }
0x10e7   :  { %v1516_v55 = vadd.f32 %v1515_v52, %v1514_v48  ;;  %v1510_v56 = vpop.f32.mrb[38].mxu0  ;;  %v2141_v52 = vld [vmem:[%s2880_s11] sm:$0xff]   ;;  %v2142_v54 = vld [vmem:[%s2880_s11 + $0x8] sm:$0xff]   ;;  %s2243_s11 = smov [#allocation2]  }
0x10e8   :  { %v1518_v58 = vsel %vm54_vm0, %v1510_v56, 0.0  ;;  %v2078_v59 = vpop.f32.mrb[39].mxu0  ;;  %s1807_s2 = sshll.u32 %s2243_s11, 4  ;;  %s1808_s2 = int_to_ptr.vmem [resolvable:$true] %s1807_s2 }
0x10e9   :  { %v2796_v11 = vadd.f32 %v1516_v55, %v2603_v37  ;;  %v1519_v61 = vadd.f32 %v1518_v58, %v1517_v57  ;;  %v2135_v37 = vld [vmem:[%s2877_s8 + $0x10] sm:$0xff]   ;;  %s2211_s23 = scalar_lea.vmem %s1808_s2, 256  ;;  %p2216_p1 = scmp.lt.s32.totalorder %s1808_s2, %s1808_s2 }
0x10ea   :  { %2080 = vmatpush3.bf16.msra.mxu1 %v2135_v37  ;;  %p2212_p0 = scmp.ne.s32.totalorder %s1808_s2, %s2211_s23  ;;  %p2217_p2 = scmp.lt.s32.totalorder %s2211_s23, %s2211_s23 }
0x10eb   :  { %v2799_v20 = vadd.f32 %v1519_v61, %v2606_v40  ;;  %v1524_v63 = vmul.f32 %v2796_v11, %v2796_v11  ;;  %2081 = vmatprep.subr.bf16.mxu1 %v2235_v8  ;;  %v2136_v40 = vld [vmem:[%s2877_s8 + $0x18] sm:$0xff]  }
0x10ec   :  { %p2218_p3 = por %p2217_p2, %p2216_p1 }
0x10ed   :  { %v1526_v4 = vsel %vm54_vm0, %v1524_v63, 0.0  ;;  %v1525_v6 = vmul.f32 %v2799_v20, %v2799_v20 }
0x10ee   :  { %1527 = vadd.xlane.f32.xlu0 %v1526_v4  ;;  %2082 = vmatpush3.bf16.msra.mxu1 %v2136_v40  ;;  %p2219_p4 = pnand %p2218_p3, %p2212_p0 }
0x10ef   :  { %v1529_v9 = vsel %vm54_vm0, %v1525_v6, 0.0  ;;  %2099 = vmatprep.subr.bf16.mxu1 %v2235_v8 }
0x10f0   :  { %1530 = vadd.xlane.f32.xlu1 %v1529_v9 }
0x117b   :  { %v1528_v10 = vpop.xlane.xlu0 %1527 }
0x117c   :  { %v1532_v13 = vmul.f32 0.03125, %v1528_v10 }
0x117d   :  { %v1531_v14 = vpop.xlane.xlu1 %1530 }
0x117e   :  { %v1534_v15 = vadd.f32 1e-06, %v1532_v13  ;;  %v1533_v3 = vmul.f32 0.03125, %v1531_v14 }
0x1180   :  { %2195 = vrsqrt.f32 %v1534_v15  ;;  %v1535_v5 = vadd.f32 1e-06, %v1533_v3 }
0x1182   :  { %2197 = vrsqrt.f32 %v1535_v5 }
0x118a   :  { %v2196_v7 = vpop.eup %2195 }
0x118b   :  { %v1538_v60 = vmul.f32 %v2196_v7, %v2796_v11 }
0x118c   :  { %v2198_v62 = vpop.eup %2197 }
0x118d   :  { %v1539_v17 = vmul.f32 %v2198_v62, %v2799_v20  ;;  %v1546_v18 = vmul.f32 %v1873_v2, %v1538_v60 }
0x118f   :  { %v1547_v19 = vmul.f32 %v1873_v2, %v1539_v17 }
0x1191   :  { %v1548_v21 = vpack.c.bf16 %v1547_v19, %v1546_v18 }
0x1193   :  { %2084 = vmatmul.mubr.msk.bf16.vlgmr.msra.gmra.mrb[32].mxu1 %vm54_vm0, %v1548_v21 }
0x1194   :  { %2103 = vmatprep.mubr.msk.bf16.mxu1 %vm2236_vm1, %v2235_v8  ;;  %2100 = vmatpush3.bf16.msra.mxu1 %v2141_v52 }
0x1195   :  { %2101 = vmatprep.subr.bf16.mxu1 %v2235_v8  ;;  %v1896_v8 = vld [vmem:[%s2879_s10] ss:$0 sm:$0xff] }
0x1198   :  { %2102 = vmatpush3.bf16.msra.mxu1 %v2142_v54 }
0x1266   :  { %v1603_v24 = vpop.f32.mrb[32].mxu1 }
0x1267   :  { %1626 = vrot.lane.b32.xlu0 %v1603_v24, %s2242_s30  ;;  %v2085_v51 = vpop.f32.mrb[33].mxu1  ;;  %v1881_v31 = vmul.f32 -1.442695, %v1603_v24 }
0x1268   :  { %v1606_v27 = vpop.f32.mrb[34].mxu1 }
0x1269   :  { %1628 = vrot.lane.b32.xlu1 %v1606_v27, %s2242_s30  ;;  %v2086_v28 = vpop.f32.mrb[35].mxu1  ;;  %v1882_v32 = vmul.f32 -1.442695, %v1606_v27  ;;  %2199 = vpow2.f32 %v1881_v31 }
0x126b   :  { %2201 = vpow2.f32 %v1882_v32 }
0x1273   :  { %v2200_v35 = vpop.eup %2199 }
0x1274   :  { %v1616_v53 = vadd.f32 1.0, %v2200_v35 }
0x1275   :  { %v2202_v36 = vpop.eup %2201 }
0x1276   :  { %v1617_v38 = vadd.f32 1.0, %v2202_v36  ;;  %2203 = vrcp.f32 %v1616_v53 }
0x1278   :  { %2205 = vrcp.f32 %v1617_v38 }
0x1280   :  { %v2204_v39 = vpop.eup %2203 }
0x1281   :  { %v1622_v43 = vmul.f32 %v2204_v39, %v1603_v24 }
0x1282   :  { %v2206_v41 = vpop.eup %2205 }
0x1283   :  { %v1623_v44 = vmul.f32 %v2206_v41, %v1606_v27 }
0x12d9   :  { %v1627_v42 = vpop.permute.xlu0 %1626 }
0x12da   :  { %v1632_v45 = vmul.f32 %v1627_v42, %v1622_v43 }
0x12db   :  { %v1629_v46 = vpop.permute.xlu1 %1628 }
0x12dc   :  { %v1633_v47 = vmul.f32 %v1629_v46, %v1623_v44 }
0x12de   :  { %v1634_v26 = vpack.c.bf16 %v1633_v47, %v1632_v45 }
0x12e0   :  { %2096 = vmatmul.mubr.msk.bf16.vlgmr.msra.gmra.mrb[40].mxu0 %vm843_vm4, %v1634_v26 }
0x13b3   :  { %v1705_v30 = vpop.f32.mrb[40].mxu0 }
0x13b4   :  { %v1712_v49 = vadd.f32 %v1705_v30, %v2796_v11  ;;  %v2097_v50 = vpop.f32.mrb[41].mxu0 }
0x13b5   :  { %v1708_v33 = vpop.f32.mrb[42].mxu0 }
0x13b6   :  { %v1715_v25 = vmul.f32 %v1712_v49, %v1712_v49  ;;  %v1713_v0 = vadd.f32 %v1708_v33, %v2799_v20  ;;  %v2098_v1 = vpop.f32.mrb[43].mxu0 }
0x13b8   :  { %v1717_v29 = vsel %vm54_vm0, %v1715_v25, 0.0  ;;  %v1716_v34 = vmul.f32 %v1713_v0, %v1713_v0 }
0x13b9   :  { %1718 = vadd.xlane.f32.xlu1 %v1717_v29 }
0x13ba   :  { %v1720_v48 = vsel %vm54_vm0, %v1716_v34, 0.0 }
0x13bb   :  { %1721 = vadd.xlane.f32.xlu0 %v1720_v48 }
0x1446   :  { %v1719_v55 = vpop.xlane.xlu1 %1718 }
0x1447   :  { %v1723_v56 = vmul.f32 0.03125, %v1719_v55 }
0x1448   :  { %v1722_v57 = vpop.xlane.xlu0 %1721 }
0x1449   :  { %v1725_v58 = vadd.f32 1e-06, %v1723_v56  ;;  %v1724_v59 = vmul.f32 0.03125, %v1722_v57 }
0x144b   :  { %2207 = vrsqrt.f32 %v1725_v58  ;;  %v1726_v11 = vadd.f32 1e-06, %v1724_v59 }
0x144d   :  { %2209 = vrsqrt.f32 %v1726_v11 }
0x1455   :  { %v2208_v61 = vpop.eup %2207 }
0x1456   :  { %v1729_v20 = vmul.f32 %v2208_v61, %v1712_v49 }
0x1457   :  { %v2210_v63 = vpop.eup %2209 }
0x1458   :  { %v1730_v4 = vmul.f32 %v2210_v63, %v1713_v0  ;;  %v1737_v6 = vmul.f32 %v1896_v8, %v1729_v20 }
0x145a   :  { %v1738_v9 = vmul.f32 %v1896_v8, %v1730_v4 }
0x145c   :  { %v1739_v37 = vpack.c.bf16 %v1738_v9, %v1737_v6 }
0x145e   :  { %2104 = vmatmul.mubr.msk.bf16.vlgmr.msra.gmra.mrb[36].mxu1 %vm54_vm0, %v1739_v37 }
0x1531   :  { %v1793_v40 = vpop.f32.mrb[36].mxu1 }
0x1532   :  { %1800 = vst [vmem:[#allocation2] sm:$0xff] %v1793_v40  ;;  %v2105_v10 = vpop.f32.mrb[37].mxu1 }
0x1533   :  { %v1796_v13 = vpop.f32.mrb[38].mxu1 }
0x1534   :  { %1801 = vst [vmem:[#allocation2 + $0x8] sm:$0xff] %v1796_v13  ;;  %v2106_v14 = vpop.f32.mrb[39].mxu1 }
0x1535   :  { %2222 = shalt.err (!%p2219_p4)
}
0x1536   :  { %s2223_s4 = scalar_lea.hbm %s2881_s12, 256 }
0x1537   :  { %p2224_p5 = scmp.ne.s32.totalorder %s2881_s12, %s2223_s4  ;;  %p2227_p6 = scmp.lt.u32.totalorder %s2223_s4, %s2881_s12 }
0x1539   :  { %p2229_p7 = pnand %p2227_p6, %p2224_p5 }
0x153b   :  { %2232 = shalt.err (!%p2229_p7)
}
0x153c   :  { %s2244_s1 = smov 128  }
0x153d   :  { %1813 = dma.vmem_to_hbm [thread:$0]  %s1808_s2, 256, %s2881_s12, [#allocation3], %s2244_s1, %s2244_s1, %s2238_s19  }
0x153e   :  { %2233 = dma.done.wait [#allocation3], 256  }
0x153f   :  { %2234 = vsyncadd [#allocation3], 4294967040 }
0x1540   :  { %1817 = vsyncpa [#allocation3], 1 }

</bundles_post_ra>
